<compile_context>
chip_gen: v5e
topology: v5e:2x2
jax: 0.10.0
libtpu: 0.0.40
codegen_flags: <defaults>
</compile_context>

<pallas_src>
import math

import jax
import jax.numpy as jnp
from jax import lax
from jax.experimental import pallas as pl
from jax.experimental.pallas import tpu as pltpu


# ----------------------------------------------------------------------------
# Weight folding: 7x7 + 5x5 + 3x3 depthwise + residual -> one (49, C) filter.
# ----------------------------------------------------------------------------
def fold_ppeg_weights(w7, w5, w3):
    """w*: (k, k, C) per-channel taps -> effective (49, C) 7x7 filter."""
    eff = w7.astype(jnp.float32)
    eff = eff + jnp.pad(w5.astype(jnp.float32), ((1, 1), (1, 1), (0, 0)))
    eff = eff + jnp.pad(w3.astype(jnp.float32), ((2, 2), (2, 2), (0, 0)))
    eff = eff.at[3, 3, :].add(1.0)       # residual branch folded into centre tap
    return eff.reshape(49, eff.shape[-1])


def _round_up(x, m):
    return ((x + m - 1) // m) * m


def _vmem_capacity_bytes():
    """Per-TensorCore VMEM (v5e/v6e: 128 MiB, v7x: 64 MiB); conservative fallback."""
    try:
        info = pltpu.get_tpu_info()
        cap = getattr(info, "vmem_capacity_bytes", None)
        if cap:
            return int(cap)
    except Exception:
        pass
    return 64 * 1024 * 1024


def _max_tile_h(W, Cp, isz, budget_bytes):
    """Largest row tile whose per-step working set fits the VMEM budget."""
    def need(th):
        win = 2 * isz * (th + 6) * (W + 6)   # double-buffered halo window
        col = 4 * (th + 6) * W               # per-dx f32 column slab
        acc = 8 * th * W                     # f32 acc + fused-expression temp
        out = 2 * isz * th * W               # double-buffered output block
        return Cp * (win + col + acc + out)
    th = 3
    while th < 512 and need(th + 1) <= budget_bytes:
        th += 1
    return th


def _choose_tile_h(H, cap):
    """Prefer a divisor of H (no host pad / output slice); fall back otherwise."""
    cap = max(1, min(cap, H))
    for th in range(cap, 0, -1):
        if H % th == 0 and (th == H or th >= 3):
            if th >= min(cap, H, 8):
                return th, True
            break                         # largest divisor is too small -> pad
    th = min(max(3, cap), H)              # fallback: pad rows on the host
    return th, (H % th == 0)


def _split_row_tiles(B, nr):
    """Factor row tiles into (parallel, sequential) chunks.

    Keeps B * n_par >= 2 so both v7x TensorCores get work even at B == 1,
    while the sequential axis carries the double-buffered DMA prefetch chain.
    """
    if B >= 2 or nr < 2:
        return 1, nr
    if nr % 2 == 0:
        return 2, nr // 2
    return 1, nr


# ----------------------------------------------------------------------------
# Pallas kernel: one (batch, row-tile) step of the folded 49-tap depthwise conv.
# ----------------------------------------------------------------------------
def _ppeg_kernel(x_hbm, w_ref, b_ref, o_ref, xwin, sem):
    # x_hbm: (B, Hk, W, Cp) un-padded image, left in HBM (pl.ANY); Hk = nr*TH
    # w_ref: (49, Cp)  folded taps (residual already in the centre tap)
    # b_ref: (1, Cp)   b7 + b5 + b3 pre-summed
    # o_ref: (1, TH, W, Cp) output row tile (auto-pipelined by BlockSpec)
    # xwin : (2, TH+6, W+6, Cp) double-buffered halo'd input window
    # sem  : (2, 3) DMA semaphores [slot, piece=(body, top halo, bottom halo)]
    b = pl.program_id(0)
    par = pl.program_id(1)
    seq = pl.program_id(2)
    n_seq = pl.num_programs(2)
    nr = pl.num_programs(1) * n_seq          # total row tiles per image

    TH = o_ref.shape[1]
    W = o_ref.shape[2]
    Cp = o_ref.shape[3]

    rt = par * n_seq + seq                   # global row-tile index
    slot = seq % 2

    def dma(t, s, start):
        """Start (or wait for) the up-to-3 static-size copies of row tile t."""
        go = (lambda c: c.start()) if start else (lambda c: c.wait())
        base = t * TH
        go(pltpu.make_async_copy(                       # body: always present
            x_hbm.at[b, pl.ds(base, TH)],
            xwin.at[s, pl.ds(3, TH), pl.ds(3, W)],
            sem.at[s, 0]))

        @pl.when(t > 0)                                 # 3 halo rows above
        def _():
            go(pltpu.make_async_copy(
                x_hbm.at[b, pl.ds(base - 3, 3)],
                xwin.at[s, pl.ds(0, 3), pl.ds(3, W)],
                sem.at[s, 1]))

        @pl.when(t < nr - 1)                            # 3 halo rows below
        def _():
            go(pltpu.make_async_copy(
                x_hbm.at[b, pl.ds(base + TH, 3)],
                xwin.at[s, pl.ds(TH + 3, 3), pl.ds(3, W)],
                sem.at[s, 2]))

    # Prime the pipeline at the start of every sequential chunk, then keep one
    # row tile of prefetch in flight (into the other xwin slot).
    @pl.when(seq == 0)
    def _():
        dma(rt, slot, start=True)

    @pl.when(seq + 1 < n_seq)
    def _():
        dma(rt + 1, 1 - slot, start=True)

    dma(rt, slot, start=False)               # wait for this tile's window

    buf = xwin.at[slot]

    # Zero-fill whatever the DMAs did not cover: the 3-column left/right halo
    # on every tile, and the 3-row top/bottom halo at the image borders
    # (== the Conv2d zero padding of the original module).
    zcol = jnp.zeros((TH + 6, 3, Cp), dtype=xwin.dtype)
    buf[:, 0:3, :] = zcol
    buf[:, W + 3:W + 6, :] = zcol

    zrow = jnp.zeros((3, W + 6, Cp), dtype=xwin.dtype)

    @pl.when(rt == 0)
    def _():
        buf[0:3, :, :] = zrow

    @pl.when(rt == nr - 1)
    def _():
        buf[TH + 3:TH + 6, :, :] = zrow

    # Folded 49-tap effective depthwise conv.
    #   outer dx: ONE re-aligned, f32-cast column slab per column shift (7 total)
    #   inner dy: free leading-dim offsets, fused into a single expression
    #   -> `acc` is read-modified-written only 7 times per tile (not 49).
    w = w_ref[...].astype(jnp.float32)                    # (49, Cp), hoisted
    bias = b_ref[...].astype(jnp.float32).reshape(1, 1, Cp)

    acc = None
    for dx in range(7):
        col = buf[:, dx:dx + W, :].astype(jnp.float32)    # (TH+6, W, Cp)
        partial = col[0:TH] * w[dx]
        for dy in range(1, 7):
            partial = partial + col[dy:dy + TH] * w[dy * 7 + dx]
        acc = (partial + bias) if acc is None else (acc + partial)

    o_ref[0] = acc.astype(o_ref.dtype)


def ppeg_pallas(x_tokens, H, W, w_eff49, bias_sum, *, tile_h=None):
    """PPEG.forward: (B, H*W, C) tokens -> (B, H*W, C) tokens."""
    B, HW, C = x_tokens.shape
    assert HW == H * W
    dtype = x_tokens.dtype
    isz = jnp.dtype(dtype).itemsize

    # Lane-dense channel axis (no-op for the production dim=512).
    Cp = _round_up(C, 128)
    xt = x_tokens if Cp == C else jnp.pad(x_tokens, ((0, 0), (0, 0), (0, Cp - C)))
    w = w_eff49.astype(jnp.float32)
    w = w if Cp == C else jnp.pad(w, ((0, 0), (0, Cp - C)))
    bias = bias_sum.astype(jnp.float32).reshape(1, C)
    bias = bias if Cp == C else jnp.pad(bias, ((0, 0), (0, Cp - C)))

    # Generation-aware VMEM sizing.
    vmem_cap = _vmem_capacity_bytes()
    vmem_limit = int(min(100 * 2**20, (vmem_cap * 3) // 4))   # 96 MiB / 48 MiB
    budget = int(min(48 * 2**20, (vmem_cap * 3) // 8))        # 48 MiB / 24 MiB

    cap = _max_tile_h(W, Cp, isz, budget)
    if tile_h is None:
        tile_h, divides = _choose_tile_h(H, cap)
    else:
        tile_h = max(1, min(int(tile_h), H))
        if tile_h < H:                      # the 3-row halo DMAs need TH >= 3
            tile_h = min(max(3, tile_h), H)
        divides = (H % tile_h == 0)

    nr = -(-H // tile_h)
    Hk = nr * tile_h                        # == H on the divisor (common) path

    x_nhwc = xt.reshape(B, H, W, Cp)
    if Hk != H:
        # Fallback (e.g. prime H with no usable divisor): pad rows on the host
        # and slice them off again below.  The common path pays nothing.
        x_nhwc = jnp.pad(x_nhwc, ((0, 0), (0, Hk - H), (0, 0), (0, 0)))

    n_par, n_seq = _split_row_tiles(B, nr)

    flops = 2 * 49 * B * Hk * W * Cp
    bytes_accessed = (B * nr * (tile_h + 6) * W * Cp * isz   # halo'd input reads
                      + B * Hk * W * Cp * isz                # output writes
                      + 49 * Cp * 4 + Cp * 4)                # taps + bias

    out = pl.pallas_call(
        _ppeg_kernel,
        out_shape=jax.ShapeDtypeStruct((B, Hk, W, Cp), dtype),
        grid_spec=pltpu.PrefetchScalarGridSpec(
            num_scalar_prefetch=0,
            grid=(B, n_par, n_seq),
            in_specs=[
                pl.BlockSpec(memory_space=pl.ANY),              # image stays in HBM
                pl.BlockSpec((49, Cp), lambda b, p, s: (0, 0)),  # folded taps
                pl.BlockSpec((1, Cp), lambda b, p, s: (0, 0)),   # summed bias
            ],
            out_specs=pl.BlockSpec(
                (1, tile_h, W, Cp),
                lambda b, p, s, ns=n_seq: (b, p * ns + s, 0, 0)),
            scratch_shapes=[
                pltpu.VMEM((2, tile_h + 6, W + 6, Cp), dtype),   # double-buffered window
                pltpu.SemaphoreType.DMA((2, 3)),
            ],
        ),
        compiler_params=pltpu.CompilerParams(
            dimension_semantics=("parallel", "parallel", "arbitrary"),
            vmem_limit_bytes=vmem_limit,
        ),
        cost_estimate=pl.CostEstimate(
            flops=flops, transcendentals=0, bytes_accessed=bytes_accessed),
    )(x_nhwc, w, bias)

    if Hk != H:
        out = out[:, :H]
    if Cp != C:
        out = out[..., :C]
    return out.reshape(B, H * W, C)


# ----------------------------------------------------------------------------
# PPEGFusion forward
# ----------------------------------------------------------------------------
def ppeg_fusion_forward(x1, x2, params):
    B, N, C = x1.shape
    H = W = int(math.ceil(math.sqrt(N)))
    add_length = H * W - N

    # torch.cat([x1, x1[:, :add_length, :]], dim=1)
    x1_padded = jnp.concatenate([x1, x1[:, :add_length, :]], axis=1)

    # self.ppeg(x1_padded, H, W)  -- Pallas hot path (folded 49-tap conv)
    w_eff = fold_ppeg_weights(params["w7"], params["w5"], params["w3"])
    x1_pos = ppeg_pallas(x1_padded, H, W, w_eff, params["bias_sum"])

    fused_in = jnp.concatenate([x1_pos, x2], axis=1)
    # TODO(synk): TransLayer(norm_layer=RMSNorm) (Nystrom attention block) was
    # not provided in the reference source, so `fusion` is an identity
    # pass-through here instead of faking its math.
    fused = fused_in
    return fused[:, :N, :]


# ----------------------------------------------------------------------------
# Pure-JAX reference for the PPEG part (depthwise conv via lax.conv)
# ----------------------------------------------------------------------------
def _depthwise_ref(x_nhwc, w_kkc, k):
    C = x_nhwc.shape[-1]
    kern = w_kkc.reshape(k, k, 1, C)      # HWIO, feature_group_count=C
    return lax.conv_general_dilated(
        x_nhwc, kern, window_strides=(1, 1),
        padding=[(k // 2, k // 2), (k // 2, k // 2)],
        dimension_numbers=("NHWC", "HWIO", "NHWC"),
        feature_group_count=C)


def ppeg_fusion_ref(x1, x2, params):
    B, N, C = x1.shape
    H = W = int(math.ceil(math.sqrt(N)))
    add_length = H * W - N
    x1_padded = jnp.concatenate([x1, x1[:, :add_length, :]], axis=1)
    feat = x1_padded.reshape(B, H, W, C)
    x_pos = (feat
             + _depthwise_ref(feat, params["w7"], 7)
             + _depthwise_ref(feat, params["w5"], 5)
             + _depthwise_ref(feat, params["w3"], 3)
             + params["bias_sum"][None, None, None, :])
    x_pos = x_pos.reshape(B, H * W, C)
    fused = jnp.concatenate([x_pos, x2], axis=1)
    return fused[:, :N, :]


# ----------------------------------------------------------------------------
if __name__ == "__main__":
    dim = 32                       # PPEG(dim); small for the test
    B, N1, N2 = 2, 14, 9           # H = W = ceil(sqrt(14)) = 4, add_length = 2

    key = jax.random.PRNGKey(0)
    (k_x1, k_x2, k_w7, k_w5, k_w3,
     k_b7, k_b5, k_b3, k_big, k_big2) = jax.random.split(key, 10)

    x1 = jax.random.normal(k_x1, (B, N1, dim), dtype=jnp.float32)
    x2 = jax.random.normal(k_x2, (B, N2, dim), dtype=jnp.float32)

    # Deterministic synthetic params.  PyTorch Conv2d(dim, dim, k, groups=dim)
    # has weight (dim, 1, k, k) and bias (dim,); we keep weights as (k, k, dim).
    def conv_init(kk, kkey, scale):
        return scale * jax.random.normal(kkey, (kk, kk, dim), dtype=jnp.float32)

    w7 = conv_init(7, k_w7, 1.0 / 7.0)
    w5 = conv_init(5, k_w5, 1.0 / 5.0)
    w3 = conv_init(3, k_w3, 1.0 / 3.0)
    b7 = 0.1 * jax.random.normal(k_b7, (dim,), dtype=jnp.float32)
    b5 = 0.1 * jax.random.normal(k_b5, (dim,), dtype=jnp.float32)
    b3 = 0.1 * jax.random.normal(k_b3, (dim,), dtype=jnp.float32)

    params = {"w7": w7, "w5": w5, "w3": w3, "bias_sum": b7 + b5 + b3}

    # --- full PPEGFusion forward (tiny shapes, single row tile) --------------
    out = ppeg_fusion_forward(x1, x2, params)
    out = jax.block_until_ready(out)
    ref = ppeg_fusion_ref(x1, x2, params)
    assert out.shape == (B, N1, dim), out.shape
    assert jnp.allclose(out, ref, atol=1e-4, rtol=1e-4), \
        float(jnp.max(jnp.abs(out - ref)))

    w_eff = fold_ppeg_weights(w7, w5, w3)

    def conv_ref(x_tok, Hh, Ww):
        feat = x_tok.reshape(x_tok.shape[0], Hh, Ww, dim)
        r = (feat
             + _depthwise_ref(feat, w7, 7)
             + _depthwise_ref(feat, w5, 5)
             + _depthwise_ref(feat, w3, 3)
             + params["bias_sum"][None, None, None, :])
        return r.reshape(x_tok.shape[0], Hh * Ww, dim)

    # --- divisor path, multi-tile, B=1: exercises the 2-way row-chunk split
    #     (both v7x cores) and the double-buffered DMA prefetch chain ---------
    Hb = Wb = 16
    xb = jax.random.normal(k_big, (1, Hb * Wb, dim), dtype=jnp.float32)
    out_b = ppeg_pallas(xb, Hb, Wb, w_eff, params["bias_sum"], tile_h=4)
    out_b = jax.block_until_ready(out_b)
    ref_b = conv_ref(xb, Hb, Wb)
    assert jnp.allclose(out_b, ref_b, atol=1e-4, rtol=1e-4), \
        float(jnp.max(jnp.abs(out_b - ref_b)))

    # --- fallback path (tile_h does not divide H -> host row pad + slice) ----
    Hc = Wc = 18
    xc = jax.random.normal(k_big2, (B, Hc * Wc, dim), dtype=jnp.float32)
    out_c = ppeg_pallas(xc, Hc, Wc, w_eff, params["bias_sum"], tile_h=8)
    out_c = jax.block_until_ready(out_c)
    ref_c = conv_ref(xc, Hc, Wc)
    assert jnp.allclose(out_c, ref_c, atol=1e-4, rtol=1e-4), \
        float(jnp.max(jnp.abs(out_c - ref_c)))

    print("KERNEL_OK")
</pallas_src>

<mosaic_0001>
module attributes {stable_mosaic.version = 11 : i64} {
  func.func @_ppeg_kernel(%arg0: i32, %arg1: i32, %arg2: i32, %arg3: memref<2x4x4x128xf32, #tpu.memory_space<any>>, %arg4: memref<49x128xf32, #tpu.memory_space<vmem>>, %arg5: memref<1x128xf32, #tpu.memory_space<vmem>>, %arg6: memref<1x4x4x128xf32, #tpu.memory_space<vmem>>, %arg7: memref<2x10x10x128xf32, #tpu.memory_space<vmem>>, %arg8: memref<2x3x!tpu.dma_semaphore, #tpu.memory_space<semaphore_mem>>) attributes {dimension_semantics = [#tpu.dimension_semantics<parallel>, #tpu.dimension_semantics<parallel>, #tpu.dimension_semantics<arbitrary>], iteration_bounds = array<i64: 2, 1, 1>, scalar_prefetch = 0 : i64, scratch_operands = 2 : i64, tpu.core_type = #tpu.core_type<tc>, window_params = [{}, {pipeline_mode = #tpu.pipeline_mode<synchronous>, transform_indices = @transform_1, window_bounds = array<i64: 49, 128>}, {pipeline_mode = #tpu.pipeline_mode<synchronous>, transform_indices = @transform_2, window_bounds = array<i64: 1, 128>}, {transform_indices = @transform_3, window_bounds = array<i64: 1, 4, 4, 128>}]} {
    %c1_i32 = arith.constant 1 : i32
    %0 = arith.muli %arg1, %c1_i32 : i32
    %1 = arith.addi %0, %arg2 : i32
    %c2_i32 = arith.constant 2 : i32
    %c0_i32 = arith.constant 0 : i32
    %2 = arith.cmpi eq, %c2_i32, %c0_i32 : i32
    %c1_i32_0 = arith.constant 1 : i32
    %3 = arith.select %2, %c1_i32_0, %c2_i32 : i32
    %4 = arith.remsi %arg2, %3 : i32
    %c0_i32_1 = arith.constant 0 : i32
    %5 = arith.cmpi ne, %4, %c0_i32_1 : i32
    %c0_i32_2 = arith.constant 0 : i32
    %6 = arith.cmpi slt, %4, %c0_i32_2 : i32
    %c0_i32_3 = arith.constant 0 : i32
    %7 = arith.cmpi slt, %3, %c0_i32_3 : i32
    %8 = arith.xori %6, %7 : i1
    %9 = arith.andi %8, %5 : i1
    %10 = arith.addi %4, %3 : i32
    %11 = arith.select %9, %10, %4 : i32
    %c0_i32_4 = arith.constant 0 : i32
    %12 = arith.cmpi eq, %arg2, %c0_i32_4 : i32
    %13 = arith.extui %12 : i1 to i32
    %c0_i32_5 = arith.constant 0 : i32
    %14 = arith.cmpi ne, %13, %c0_i32_5 : i32
    scf.if %14 {
      %c4_i32_77 = arith.constant 4 : i32
      %417 = arith.muli %1, %c4_i32_77 : i32
      %c0_i32_78 = arith.constant 0 : i32
      %c0_i32_79 = arith.constant 0 : i32
      %c0_i32_80 = arith.constant 0 : i32
      %418 = tpu.memref_slice %arg3[%arg0, %417, %c0_i32_79, %c0_i32_80] : memref<2x4x4x128xf32, #tpu.memory_space<any>> -> memref<1x4x4x128xf32, #tpu.memory_space<any>>
      %419 = tpu.memref_squeeze %418 : memref<1x4x4x128xf32, #tpu.memory_space<any>> -> memref<4x4x128xf32, #tpu.memory_space<any>>
      %c3_i32_81 = arith.constant 3 : i32
      %c3_i32_82 = arith.constant 3 : i32
      %c0_i32_83 = arith.constant 0 : i32
      %420 = tpu.memref_slice %arg7[%11, %c3_i32_81, %c3_i32_82, %c0_i32_83] : memref<2x10x10x128xf32, #tpu.memory_space<vmem>> -> memref<1x4x4x128xf32, #tpu.memory_space<vmem>>
      %421 = tpu.memref_squeeze %420 : memref<1x4x4x128xf32, #tpu.memory_space<vmem>> -> memref<4x4x128xf32, #tpu.memory_space<vmem>>
      %422 = tpu.memref_slice %arg8[%11, %c0_i32_78] : memref<2x3x!tpu.dma_semaphore, #tpu.memory_space<semaphore_mem>> -> memref<1x1x!tpu.dma_semaphore, #tpu.memory_space<semaphore_mem>>
      %423 = tpu.memref_squeeze %422 : memref<1x1x!tpu.dma_semaphore, #tpu.memory_space<semaphore_mem>> -> memref<!tpu.dma_semaphore, #tpu.memory_space<semaphore_mem>>
      tpu.enqueue_dma source(%419 : memref<4x4x128xf32, #tpu.memory_space<any>>) target(%421 : memref<4x4x128xf32, #tpu.memory_space<vmem>>) target_semaphore(%423 : memref<!tpu.dma_semaphore, #tpu.memory_space<semaphore_mem>>)
      %c0_i32_84 = arith.constant 0 : i32
      %424 = arith.cmpi sgt, %1, %c0_i32_84 : i32
      %425 = arith.extui %424 : i1 to i32
      %c0_i32_85 = arith.constant 0 : i32
      %426 = arith.cmpi ne, %425, %c0_i32_85 : i32
      scf.if %426 {
        %c3_i32_88 = arith.constant 3 : i32
        %430 = arith.subi %417, %c3_i32_88 : i32
        %c1_i32_89 = arith.constant 1 : i32
        %c0_i32_90 = arith.constant 0 : i32
        %c0_i32_91 = arith.constant 0 : i32
        %431 = tpu.memref_slice %arg3[%arg0, %430, %c0_i32_90, %c0_i32_91] : memref<2x4x4x128xf32, #tpu.memory_space<any>> -> memref<1x3x4x128xf32, #tpu.memory_space<any>>
        %432 = tpu.memref_squeeze %431 : memref<1x3x4x128xf32, #tpu.memory_space<any>> -> memref<3x4x128xf32, #tpu.memory_space<any>>
        %c0_i32_92 = arith.constant 0 : i32
        %c3_i32_93 = arith.constant 3 : i32
        %c0_i32_94 = arith.constant 0 : i32
        %433 = tpu.memref_slice %arg7[%11, %c0_i32_92, %c3_i32_93, %c0_i32_94] : memref<2x10x10x128xf32, #tpu.memory_space<vmem>> -> memref<1x3x4x128xf32, #tpu.memory_space<vmem>>
        %434 = tpu.memref_squeeze %433 : memref<1x3x4x128xf32, #tpu.memory_space<vmem>> -> memref<3x4x128xf32, #tpu.memory_space<vmem>>
        %435 = tpu.memref_slice %arg8[%11, %c1_i32_89] : memref<2x3x!tpu.dma_semaphore, #tpu.memory_space<semaphore_mem>> -> memref<1x1x!tpu.dma_semaphore, #tpu.memory_space<semaphore_mem>>
        %436 = tpu.memref_squeeze %435 : memref<1x1x!tpu.dma_semaphore, #tpu.memory_space<semaphore_mem>> -> memref<!tpu.dma_semaphore, #tpu.memory_space<semaphore_mem>>
        tpu.enqueue_dma source(%432 : memref<3x4x128xf32, #tpu.memory_space<any>>) target(%434 : memref<3x4x128xf32, #tpu.memory_space<vmem>>) target_semaphore(%436 : memref<!tpu.dma_semaphore, #tpu.memory_space<semaphore_mem>>)
      } else {
      }
      %c0_i32_86 = arith.constant 0 : i32
      %427 = arith.cmpi slt, %1, %c0_i32_86 : i32
      %428 = arith.extui %427 : i1 to i32
      %c0_i32_87 = arith.constant 0 : i32
      %429 = arith.cmpi ne, %428, %c0_i32_87 : i32
      scf.if %429 {
        %c4_i32_88 = arith.constant 4 : i32
        %430 = arith.addi %417, %c4_i32_88 : i32
        %c2_i32_89 = arith.constant 2 : i32
        %c0_i32_90 = arith.constant 0 : i32
        %c0_i32_91 = arith.constant 0 : i32
        %431 = tpu.memref_slice %arg3[%arg0, %430, %c0_i32_90, %c0_i32_91] : memref<2x4x4x128xf32, #tpu.memory_space<any>> -> memref<1x3x4x128xf32, #tpu.memory_space<any>>
        %432 = tpu.memref_squeeze %431 : memref<1x3x4x128xf32, #tpu.memory_space<any>> -> memref<3x4x128xf32, #tpu.memory_space<any>>
        %c7_i32 = arith.constant 7 : i32
        %c3_i32_92 = arith.constant 3 : i32
        %c0_i32_93 = arith.constant 0 : i32
        %433 = tpu.memref_slice %arg7[%11, %c7_i32, %c3_i32_92, %c0_i32_93] : memref<2x10x10x128xf32, #tpu.memory_space<vmem>> -> memref<1x3x4x128xf32, #tpu.memory_space<vmem>>
        %434 = tpu.memref_squeeze %433 : memref<1x3x4x128xf32, #tpu.memory_space<vmem>> -> memref<3x4x128xf32, #tpu.memory_space<vmem>>
        %435 = tpu.memref_slice %arg8[%11, %c2_i32_89] : memref<2x3x!tpu.dma_semaphore, #tpu.memory_space<semaphore_mem>> -> memref<1x1x!tpu.dma_semaphore, #tpu.memory_space<semaphore_mem>>
        %436 = tpu.memref_squeeze %435 : memref<1x1x!tpu.dma_semaphore, #tpu.memory_space<semaphore_mem>> -> memref<!tpu.dma_semaphore, #tpu.memory_space<semaphore_mem>>
        tpu.enqueue_dma source(%432 : memref<3x4x128xf32, #tpu.memory_space<any>>) target(%434 : memref<3x4x128xf32, #tpu.memory_space<vmem>>) target_semaphore(%436 : memref<!tpu.dma_semaphore, #tpu.memory_space<semaphore_mem>>)
      } else {
      }
    } else {
    }
    %c1_i32_6 = arith.constant 1 : i32
    %15 = arith.addi %arg2, %c1_i32_6 : i32
    %c1_i32_7 = arith.constant 1 : i32
    %16 = arith.cmpi slt, %15, %c1_i32_7 : i32
    %17 = arith.extui %16 : i1 to i32
    %c0_i32_8 = arith.constant 0 : i32
    %18 = arith.cmpi ne, %17, %c0_i32_8 : i32
    scf.if %18 {
      %c1_i32_77 = arith.constant 1 : i32
      %417 = arith.addi %1, %c1_i32_77 : i32
      %c1_i32_78 = arith.constant 1 : i32
      %418 = arith.subi %c1_i32_78, %11 : i32
      %c4_i32_79 = arith.constant 4 : i32
      %419 = arith.muli %417, %c4_i32_79 : i32
      %c0_i32_80 = arith.constant 0 : i32
      %c0_i32_81 = arith.constant 0 : i32
      %c0_i32_82 = arith.constant 0 : i32
      %420 = tpu.memref_slice %arg3[%arg0, %419, %c0_i32_81, %c0_i32_82] : memref<2x4x4x128xf32, #tpu.memory_space<any>> -> memref<1x4x4x128xf32, #tpu.memory_space<any>>
      %421 = tpu.memref_squeeze %420 : memref<1x4x4x128xf32, #tpu.memory_space<any>> -> memref<4x4x128xf32, #tpu.memory_space<any>>
      %c3_i32_83 = arith.constant 3 : i32
      %c3_i32_84 = arith.constant 3 : i32
      %c0_i32_85 = arith.constant 0 : i32
      %422 = tpu.memref_slice %arg7[%418, %c3_i32_83, %c3_i32_84, %c0_i32_85] : memref<2x10x10x128xf32, #tpu.memory_space<vmem>> -> memref<1x4x4x128xf32, #tpu.memory_space<vmem>>
      %423 = tpu.memref_squeeze %422 : memref<1x4x4x128xf32, #tpu.memory_space<vmem>> -> memref<4x4x128xf32, #tpu.memory_space<vmem>>
      %424 = tpu.memref_slice %arg8[%418, %c0_i32_80] : memref<2x3x!tpu.dma_semaphore, #tpu.memory_space<semaphore_mem>> -> memref<1x1x!tpu.dma_semaphore, #tpu.memory_space<semaphore_mem>>
      %425 = tpu.memref_squeeze %424 : memref<1x1x!tpu.dma_semaphore, #tpu.memory_space<semaphore_mem>> -> memref<!tpu.dma_semaphore, #tpu.memory_space<semaphore_mem>>
      tpu.enqueue_dma source(%421 : memref<4x4x128xf32, #tpu.memory_space<any>>) target(%423 : memref<4x4x128xf32, #tpu.memory_space<vmem>>) target_semaphore(%425 : memref<!tpu.dma_semaphore, #tpu.memory_space<semaphore_mem>>)
      %c0_i32_86 = arith.constant 0 : i32
      %426 = arith.cmpi sgt, %417, %c0_i32_86 : i32
      %427 = arith.extui %426 : i1 to i32
      %c0_i32_87 = arith.constant 0 : i32
      %428 = arith.cmpi ne, %427, %c0_i32_87 : i32
      scf.if %428 {
        %c3_i32_90 = arith.constant 3 : i32
        %432 = arith.subi %419, %c3_i32_90 : i32
        %c1_i32_91 = arith.constant 1 : i32
        %c0_i32_92 = arith.constant 0 : i32
        %c0_i32_93 = arith.constant 0 : i32
        %433 = tpu.memref_slice %arg3[%arg0, %432, %c0_i32_92, %c0_i32_93] : memref<2x4x4x128xf32, #tpu.memory_space<any>> -> memref<1x3x4x128xf32, #tpu.memory_space<any>>
        %434 = tpu.memref_squeeze %433 : memref<1x3x4x128xf32, #tpu.memory_space<any>> -> memref<3x4x128xf32, #tpu.memory_space<any>>
        %c0_i32_94 = arith.constant 0 : i32
        %c3_i32_95 = arith.constant 3 : i32
        %c0_i32_96 = arith.constant 0 : i32
        %435 = tpu.memref_slice %arg7[%418, %c0_i32_94, %c3_i32_95, %c0_i32_96] : memref<2x10x10x128xf32, #tpu.memory_space<vmem>> -> memref<1x3x4x128xf32, #tpu.memory_space<vmem>>
        %436 = tpu.memref_squeeze %435 : memref<1x3x4x128xf32, #tpu.memory_space<vmem>> -> memref<3x4x128xf32, #tpu.memory_space<vmem>>
        %437 = tpu.memref_slice %arg8[%418, %c1_i32_91] : memref<2x3x!tpu.dma_semaphore, #tpu.memory_space<semaphore_mem>> -> memref<1x1x!tpu.dma_semaphore, #tpu.memory_space<semaphore_mem>>
        %438 = tpu.memref_squeeze %437 : memref<1x1x!tpu.dma_semaphore, #tpu.memory_space<semaphore_mem>> -> memref<!tpu.dma_semaphore, #tpu.memory_space<semaphore_mem>>
        tpu.enqueue_dma source(%434 : memref<3x4x128xf32, #tpu.memory_space<any>>) target(%436 : memref<3x4x128xf32, #tpu.memory_space<vmem>>) target_semaphore(%438 : memref<!tpu.dma_semaphore, #tpu.memory_space<semaphore_mem>>)
      } else {
      }
      %c0_i32_88 = arith.constant 0 : i32
      %429 = arith.cmpi slt, %417, %c0_i32_88 : i32
      %430 = arith.extui %429 : i1 to i32
      %c0_i32_89 = arith.constant 0 : i32
      %431 = arith.cmpi ne, %430, %c0_i32_89 : i32
      scf.if %431 {
        %c4_i32_90 = arith.constant 4 : i32
        %432 = arith.addi %419, %c4_i32_90 : i32
        %c2_i32_91 = arith.constant 2 : i32
        %c0_i32_92 = arith.constant 0 : i32
        %c0_i32_93 = arith.constant 0 : i32
        %433 = tpu.memref_slice %arg3[%arg0, %432, %c0_i32_92, %c0_i32_93] : memref<2x4x4x128xf32, #tpu.memory_space<any>> -> memref<1x3x4x128xf32, #tpu.memory_space<any>>
        %434 = tpu.memref_squeeze %433 : memref<1x3x4x128xf32, #tpu.memory_space<any>> -> memref<3x4x128xf32, #tpu.memory_space<any>>
        %c7_i32 = arith.constant 7 : i32
        %c3_i32_94 = arith.constant 3 : i32
        %c0_i32_95 = arith.constant 0 : i32
        %435 = tpu.memref_slice %arg7[%418, %c7_i32, %c3_i32_94, %c0_i32_95] : memref<2x10x10x128xf32, #tpu.memory_space<vmem>> -> memref<1x3x4x128xf32, #tpu.memory_space<vmem>>
        %436 = tpu.memref_squeeze %435 : memref<1x3x4x128xf32, #tpu.memory_space<vmem>> -> memref<3x4x128xf32, #tpu.memory_space<vmem>>
        %437 = tpu.memref_slice %arg8[%418, %c2_i32_91] : memref<2x3x!tpu.dma_semaphore, #tpu.memory_space<semaphore_mem>> -> memref<1x1x!tpu.dma_semaphore, #tpu.memory_space<semaphore_mem>>
        %438 = tpu.memref_squeeze %437 : memref<1x1x!tpu.dma_semaphore, #tpu.memory_space<semaphore_mem>> -> memref<!tpu.dma_semaphore, #tpu.memory_space<semaphore_mem>>
        tpu.enqueue_dma source(%434 : memref<3x4x128xf32, #tpu.memory_space<any>>) target(%436 : memref<3x4x128xf32, #tpu.memory_space<vmem>>) target_semaphore(%438 : memref<!tpu.dma_semaphore, #tpu.memory_space<semaphore_mem>>)
      } else {
      }
    } else {
    }
    %c4_i32 = arith.constant 4 : i32
    %19 = arith.muli %1, %c4_i32 : i32
    %c0_i32_9 = arith.constant 0 : i32
    %c0_i32_10 = arith.constant 0 : i32
    %c0_i32_11 = arith.constant 0 : i32
    %20 = tpu.memref_slice %arg3[%arg0, %19, %c0_i32_10, %c0_i32_11] : memref<2x4x4x128xf32, #tpu.memory_space<any>> -> memref<1x4x4x128xf32, #tpu.memory_space<any>>
    %21 = tpu.memref_squeeze %20 : memref<1x4x4x128xf32, #tpu.memory_space<any>> -> memref<4x4x128xf32, #tpu.memory_space<any>>
    %c3_i32 = arith.constant 3 : i32
    %c3_i32_12 = arith.constant 3 : i32
    %c0_i32_13 = arith.constant 0 : i32
    %22 = tpu.memref_slice %arg7[%11, %c3_i32, %c3_i32_12, %c0_i32_13] : memref<2x10x10x128xf32, #tpu.memory_space<vmem>> -> memref<1x4x4x128xf32, #tpu.memory_space<vmem>>
    %23 = tpu.memref_squeeze %22 : memref<1x4x4x128xf32, #tpu.memory_space<vmem>> -> memref<4x4x128xf32, #tpu.memory_space<vmem>>
    %24 = tpu.memref_slice %arg8[%11, %c0_i32_9] : memref<2x3x!tpu.dma_semaphore, #tpu.memory_space<semaphore_mem>> -> memref<1x1x!tpu.dma_semaphore, #tpu.memory_space<semaphore_mem>>
    %25 = tpu.memref_squeeze %24 : memref<1x1x!tpu.dma_semaphore, #tpu.memory_space<semaphore_mem>> -> memref<!tpu.dma_semaphore, #tpu.memory_space<semaphore_mem>>
    tpu.wait_dma2 semaphore(%25 : memref<!tpu.dma_semaphore, #tpu.memory_space<semaphore_mem>>) src(%21 : memref<4x4x128xf32, #tpu.memory_space<any>>) dst(%23 : memref<4x4x128xf32, #tpu.memory_space<vmem>>)
    %c0_i32_14 = arith.constant 0 : i32
    %26 = arith.cmpi sgt, %1, %c0_i32_14 : i32
    %27 = arith.extui %26 : i1 to i32
    %c0_i32_15 = arith.constant 0 : i32
    %28 = arith.cmpi ne, %27, %c0_i32_15 : i32
    scf.if %28 {
      %c3_i32_77 = arith.constant 3 : i32
      %417 = arith.subi %19, %c3_i32_77 : i32
      %c1_i32_78 = arith.constant 1 : i32
      %c0_i32_79 = arith.constant 0 : i32
      %c0_i32_80 = arith.constant 0 : i32
      %418 = tpu.memref_slice %arg3[%arg0, %417, %c0_i32_79, %c0_i32_80] : memref<2x4x4x128xf32, #tpu.memory_space<any>> -> memref<1x3x4x128xf32, #tpu.memory_space<any>>
      %419 = tpu.memref_squeeze %418 : memref<1x3x4x128xf32, #tpu.memory_space<any>> -> memref<3x4x128xf32, #tpu.memory_space<any>>
      %c0_i32_81 = arith.constant 0 : i32
      %c3_i32_82 = arith.constant 3 : i32
      %c0_i32_83 = arith.constant 0 : i32
      %420 = tpu.memref_slice %arg7[%11, %c0_i32_81, %c3_i32_82, %c0_i32_83] : memref<2x10x10x128xf32, #tpu.memory_space<vmem>> -> memref<1x3x4x128xf32, #tpu.memory_space<vmem>>
      %421 = tpu.memref_squeeze %420 : memref<1x3x4x128xf32, #tpu.memory_space<vmem>> -> memref<3x4x128xf32, #tpu.memory_space<vmem>>
      %422 = tpu.memref_slice %arg8[%11, %c1_i32_78] : memref<2x3x!tpu.dma_semaphore, #tpu.memory_space<semaphore_mem>> -> memref<1x1x!tpu.dma_semaphore, #tpu.memory_space<semaphore_mem>>
      %423 = tpu.memref_squeeze %422 : memref<1x1x!tpu.dma_semaphore, #tpu.memory_space<semaphore_mem>> -> memref<!tpu.dma_semaphore, #tpu.memory_space<semaphore_mem>>
      tpu.wait_dma2 semaphore(%423 : memref<!tpu.dma_semaphore, #tpu.memory_space<semaphore_mem>>) src(%419 : memref<3x4x128xf32, #tpu.memory_space<any>>) dst(%421 : memref<3x4x128xf32, #tpu.memory_space<vmem>>)
    } else {
    }
    %c0_i32_16 = arith.constant 0 : i32
    %29 = arith.cmpi slt, %1, %c0_i32_16 : i32
    %30 = arith.extui %29 : i1 to i32
    %c0_i32_17 = arith.constant 0 : i32
    %31 = arith.cmpi ne, %30, %c0_i32_17 : i32
    scf.if %31 {
      %c4_i32_77 = arith.constant 4 : i32
      %417 = arith.addi %19, %c4_i32_77 : i32
      %c2_i32_78 = arith.constant 2 : i32
      %c0_i32_79 = arith.constant 0 : i32
      %c0_i32_80 = arith.constant 0 : i32
      %418 = tpu.memref_slice %arg3[%arg0, %417, %c0_i32_79, %c0_i32_80] : memref<2x4x4x128xf32, #tpu.memory_space<any>> -> memref<1x3x4x128xf32, #tpu.memory_space<any>>
      %419 = tpu.memref_squeeze %418 : memref<1x3x4x128xf32, #tpu.memory_space<any>> -> memref<3x4x128xf32, #tpu.memory_space<any>>
      %c7_i32 = arith.constant 7 : i32
      %c3_i32_81 = arith.constant 3 : i32
      %c0_i32_82 = arith.constant 0 : i32
      %420 = tpu.memref_slice %arg7[%11, %c7_i32, %c3_i32_81, %c0_i32_82] : memref<2x10x10x128xf32, #tpu.memory_space<vmem>> -> memref<1x3x4x128xf32, #tpu.memory_space<vmem>>
      %421 = tpu.memref_squeeze %420 : memref<1x3x4x128xf32, #tpu.memory_space<vmem>> -> memref<3x4x128xf32, #tpu.memory_space<vmem>>
      %422 = tpu.memref_slice %arg8[%11, %c2_i32_78] : memref<2x3x!tpu.dma_semaphore, #tpu.memory_space<semaphore_mem>> -> memref<1x1x!tpu.dma_semaphore, #tpu.memory_space<semaphore_mem>>
      %423 = tpu.memref_squeeze %422 : memref<1x1x!tpu.dma_semaphore, #tpu.memory_space<semaphore_mem>> -> memref<!tpu.dma_semaphore, #tpu.memory_space<semaphore_mem>>
      tpu.wait_dma2 semaphore(%423 : memref<!tpu.dma_semaphore, #tpu.memory_space<semaphore_mem>>) src(%419 : memref<3x4x128xf32, #tpu.memory_space<any>>) dst(%421 : memref<3x4x128xf32, #tpu.memory_space<vmem>>)
    } else {
    }
    %cst = arith.constant 0.000000e+00 : f32
    %32 = vector.broadcast %cst : f32 to vector<10x3x128xf32>
    %c0_i32_18 = arith.constant 0 : i32
    %c0_i32_19 = arith.constant 0 : i32
    %c0_i32_20 = arith.constant 0 : i32
    %33 = tpu.memref_slice %arg7[%11, %c0_i32_18, %c0_i32_19, %c0_i32_20] : memref<2x10x10x128xf32, #tpu.memory_space<vmem>> -> memref<1x10x10x128xf32, #tpu.memory_space<vmem>>
    %34 = tpu.memref_squeeze %33 : memref<1x10x10x128xf32, #tpu.memory_space<vmem>> -> memref<10x10x128xf32, #tpu.memory_space<vmem>>
    %c0 = arith.constant 0 : index
    %c0_21 = arith.constant 0 : index
    %c0_22 = arith.constant 0 : index
    %35 = vector.load %34[%c0, %c0_21, %c0_22] : memref<10x10x128xf32, #tpu.memory_space<vmem>>, vector<10x3x128xf32>
    tpu.vector_store %34[%c0, %c0_21, %c0_22], %32 {strides = array<i32>} : memref<10x10x128xf32, #tpu.memory_space<vmem>>, vector<10x3x128xf32>,
    %c0_i32_23 = arith.constant 0 : i32
    %c0_i32_24 = arith.constant 0 : i32
    %c0_i32_25 = arith.constant 0 : i32
    %36 = tpu.memref_slice %arg7[%11, %c0_i32_23, %c0_i32_24, %c0_i32_25] : memref<2x10x10x128xf32, #tpu.memory_space<vmem>> -> memref<1x10x10x128xf32, #tpu.memory_space<vmem>>
    %37 = tpu.memref_squeeze %36 : memref<1x10x10x128xf32, #tpu.memory_space<vmem>> -> memref<10x10x128xf32, #tpu.memory_space<vmem>>
    %c0_26 = arith.constant 0 : index
    %c7 = arith.constant 7 : index
    %c0_27 = arith.constant 0 : index
    %38 = vector.load %37[%c0_26, %c7, %c0_27] : memref<10x10x128xf32, #tpu.memory_space<vmem>>, vector<10x3x128xf32>
    tpu.vector_store %37[%c0_26, %c7, %c0_27], %32 {strides = array<i32>} : memref<10x10x128xf32, #tpu.memory_space<vmem>>, vector<10x3x128xf32>,
    %cst_28 = arith.constant 0.000000e+00 : f32
    %39 = vector.broadcast %cst_28 : f32 to vector<3x10x128xf32>
    %c0_i32_29 = arith.constant 0 : i32
    %40 = arith.cmpi eq, %1, %c0_i32_29 : i32
    %41 = arith.extui %40 : i1 to i32
    %c0_i32_30 = arith.constant 0 : i32
    %42 = arith.cmpi ne, %41, %c0_i32_30 : i32
    scf.if %42 {
      %c0_i32_77 = arith.constant 0 : i32
      %c0_i32_78 = arith.constant 0 : i32
      %c0_i32_79 = arith.constant 0 : i32
      %417 = tpu.memref_slice %arg7[%11, %c0_i32_77, %c0_i32_78, %c0_i32_79] : memref<2x10x10x128xf32, #tpu.memory_space<vmem>> -> memref<1x10x10x128xf32, #tpu.memory_space<vmem>>
      %418 = tpu.memref_squeeze %417 : memref<1x10x10x128xf32, #tpu.memory_space<vmem>> -> memref<10x10x128xf32, #tpu.memory_space<vmem>>
      %c0_80 = arith.constant 0 : index
      %c0_81 = arith.constant 0 : index
      %c0_82 = arith.constant 0 : index
      %419 = vector.load %418[%c0_80, %c0_81, %c0_82] : memref<10x10x128xf32, #tpu.memory_space<vmem>>, vector<3x10x128xf32>
      tpu.vector_store %418[%c0_80, %c0_81, %c0_82], %39 {strides = array<i32>} : memref<10x10x128xf32, #tpu.memory_space<vmem>>, vector<3x10x128xf32>,
    } else {
    }
    %c0_i32_31 = arith.constant 0 : i32
    %43 = arith.cmpi eq, %1, %c0_i32_31 : i32
    %44 = arith.extui %43 : i1 to i32
    %c0_i32_32 = arith.constant 0 : i32
    %45 = arith.cmpi ne, %44, %c0_i32_32 : i32
    scf.if %45 {
      %c0_i32_77 = arith.constant 0 : i32
      %c0_i32_78 = arith.constant 0 : i32
      %c0_i32_79 = arith.constant 0 : i32
      %417 = tpu.memref_slice %arg7[%11, %c0_i32_77, %c0_i32_78, %c0_i32_79] : memref<2x10x10x128xf32, #tpu.memory_space<vmem>> -> memref<1x10x10x128xf32, #tpu.memory_space<vmem>>
      %418 = tpu.memref_squeeze %417 : memref<1x10x10x128xf32, #tpu.memory_space<vmem>> -> memref<10x10x128xf32, #tpu.memory_space<vmem>>
      %c7_80 = arith.constant 7 : index
      %c0_81 = arith.constant 0 : index
      %c0_82 = arith.constant 0 : index
      %419 = vector.load %418[%c7_80, %c0_81, %c0_82] : memref<10x10x128xf32, #tpu.memory_space<vmem>>, vector<3x10x128xf32>
      tpu.vector_store %418[%c7_80, %c0_81, %c0_82], %39 {strides = array<i32>} : memref<10x10x128xf32, #tpu.memory_space<vmem>>, vector<3x10x128xf32>,
    } else {
    }
    %c0_33 = arith.constant 0 : index
    %c0_34 = arith.constant 0 : index
    %46 = vector.load %arg4[%c0_33, %c0_34] : memref<49x128xf32, #tpu.memory_space<vmem>>, vector<49x128xf32>
    %c0_35 = arith.constant 0 : index
    %c0_36 = arith.constant 0 : index
    %47 = vector.load %arg5[%c0_35, %c0_36] : memref<1x128xf32, #tpu.memory_space<vmem>>, vector<1x128xf32>
    %48 = vector.shape_cast %47 : vector<1x128xf32> to vector<1x1x128xf32>
    %c0_i32_37 = arith.constant 0 : i32
    %c0_i32_38 = arith.constant 0 : i32
    %c0_i32_39 = arith.constant 0 : i32
    %49 = tpu.memref_slice %arg7[%11, %c0_i32_37, %c0_i32_38, %c0_i32_39] : memref<2x10x10x128xf32, #tpu.memory_space<vmem>> -> memref<1x10x10x128xf32, #tpu.memory_space<vmem>>
    %50 = tpu.memref_squeeze %49 : memref<1x10x10x128xf32, #tpu.memory_space<vmem>> -> memref<10x10x128xf32, #tpu.memory_space<vmem>>
    %c0_40 = arith.constant 0 : index
    %c0_41 = arith.constant 0 : index
    %c0_42 = arith.constant 0 : index
    %51 = vector.load %50[%c0_40, %c0_41, %c0_42] : memref<10x10x128xf32, #tpu.memory_space<vmem>>, vector<10x4x128xf32>
    %52 = vector.extract_strided_slice %51 {offsets = [0, 0, 0], sizes = [4, 4, 128], strides = [1, 1, 1]} : vector<10x4x128xf32> to vector<4x4x128xf32>
    %53 = vector.extract_strided_slice %46 {offsets = [0, 0], sizes = [1, 128], strides = [1, 1]} : vector<49x128xf32> to vector<1x128xf32>
    %54 = vector.shape_cast %53 : vector<1x128xf32> to vector<128xf32>
    %55 = vector.shape_cast %54 : vector<128xf32> to vector<1x1x128xf32>
    %56 = vector.broadcast %55 : vector<1x1x128xf32> to vector<4x4x128xf32>
    %57 = arith.mulf %52, %56 : vector<4x4x128xf32>
    %58 = vector.extract_strided_slice %51 {offsets = [1, 0, 0], sizes = [4, 4, 128], strides = [1, 1, 1]} : vector<10x4x128xf32> to vector<4x4x128xf32>
    %59 = vector.extract_strided_slice %46 {offsets = [7, 0], sizes = [1, 128], strides = [1, 1]} : vector<49x128xf32> to vector<1x128xf32>
    %60 = vector.shape_cast %59 : vector<1x128xf32> to vector<128xf32>
    %61 = vector.shape_cast %60 : vector<128xf32> to vector<1x1x128xf32>
    %62 = vector.broadcast %61 : vector<1x1x128xf32> to vector<4x4x128xf32>
    %63 = arith.mulf %58, %62 : vector<4x4x128xf32>
    %64 = arith.addf %57, %63 : vector<4x4x128xf32>
    %65 = vector.extract_strided_slice %51 {offsets = [2, 0, 0], sizes = [4, 4, 128], strides = [1, 1, 1]} : vector<10x4x128xf32> to vector<4x4x128xf32>
    %66 = vector.extract_strided_slice %46 {offsets = [14, 0], sizes = [1, 128], strides = [1, 1]} : vector<49x128xf32> to vector<1x128xf32>
    %67 = vector.shape_cast %66 : vector<1x128xf32> to vector<128xf32>
    %68 = vector.shape_cast %67 : vector<128xf32> to vector<1x1x128xf32>
    %69 = vector.broadcast %68 : vector<1x1x128xf32> to vector<4x4x128xf32>
    %70 = arith.mulf %65, %69 : vector<4x4x128xf32>
    %71 = arith.addf %64, %70 : vector<4x4x128xf32>
    %72 = vector.extract_strided_slice %51 {offsets = [3, 0, 0], sizes = [4, 4, 128], strides = [1, 1, 1]} : vector<10x4x128xf32> to vector<4x4x128xf32>
    %73 = vector.extract_strided_slice %46 {offsets = [21, 0], sizes = [1, 128], strides = [1, 1]} : vector<49x128xf32> to vector<1x128xf32>
    %74 = vector.shape_cast %73 : vector<1x128xf32> to vector<128xf32>
    %75 = vector.shape_cast %74 : vector<128xf32> to vector<1x1x128xf32>
    %76 = vector.broadcast %75 : vector<1x1x128xf32> to vector<4x4x128xf32>
    %77 = arith.mulf %72, %76 : vector<4x4x128xf32>
    %78 = arith.addf %71, %77 : vector<4x4x128xf32>
    %79 = vector.extract_strided_slice %51 {offsets = [4, 0, 0], sizes = [4, 4, 128], strides = [1, 1, 1]} : vector<10x4x128xf32> to vector<4x4x128xf32>
    %80 = vector.extract_strided_slice %46 {offsets = [28, 0], sizes = [1, 128], strides = [1, 1]} : vector<49x128xf32> to vector<1x128xf32>
    %81 = vector.shape_cast %80 : vector<1x128xf32> to vector<128xf32>
    %82 = vector.shape_cast %81 : vector<128xf32> to vector<1x1x128xf32>
    %83 = vector.broadcast %82 : vector<1x1x128xf32> to vector<4x4x128xf32>
    %84 = arith.mulf %79, %83 : vector<4x4x128xf32>
    %85 = arith.addf %78, %84 : vector<4x4x128xf32>
    %86 = vector.extract_strided_slice %51 {offsets = [5, 0, 0], sizes = [4, 4, 128], strides = [1, 1, 1]} : vector<10x4x128xf32> to vector<4x4x128xf32>
    %87 = vector.extract_strided_slice %46 {offsets = [35, 0], sizes = [1, 128], strides = [1, 1]} : vector<49x128xf32> to vector<1x128xf32>
    %88 = vector.shape_cast %87 : vector<1x128xf32> to vector<128xf32>
    %89 = vector.shape_cast %88 : vector<128xf32> to vector<1x1x128xf32>
    %90 = vector.broadcast %89 : vector<1x1x128xf32> to vector<4x4x128xf32>
    %91 = arith.mulf %86, %90 : vector<4x4x128xf32>
    %92 = arith.addf %85, %91 : vector<4x4x128xf32>
    %93 = vector.extract_strided_slice %51 {offsets = [6, 0, 0], sizes = [4, 4, 128], strides = [1, 1, 1]} : vector<10x4x128xf32> to vector<4x4x128xf32>
    %94 = vector.extract_strided_slice %46 {offsets = [42, 0], sizes = [1, 128], strides = [1, 1]} : vector<49x128xf32> to vector<1x128xf32>
    %95 = vector.shape_cast %94 : vector<1x128xf32> to vector<128xf32>
    %96 = vector.shape_cast %95 : vector<128xf32> to vector<1x1x128xf32>
    %97 = vector.broadcast %96 : vector<1x1x128xf32> to vector<4x4x128xf32>
    %98 = arith.mulf %93, %97 : vector<4x4x128xf32>
    %99 = arith.addf %92, %98 : vector<4x4x128xf32>
    %100 = vector.broadcast %48 : vector<1x1x128xf32> to vector<4x4x128xf32>
    %101 = arith.addf %99, %100 : vector<4x4x128xf32>
    %c0_i32_43 = arith.constant 0 : i32
    %c0_i32_44 = arith.constant 0 : i32
    %c0_i32_45 = arith.constant 0 : i32
    %102 = tpu.memref_slice %arg7[%11, %c0_i32_43, %c0_i32_44, %c0_i32_45] : memref<2x10x10x128xf32, #tpu.memory_space<vmem>> -> memref<1x10x10x128xf32, #tpu.memory_space<vmem>>
    %103 = tpu.memref_squeeze %102 : memref<1x10x10x128xf32, #tpu.memory_space<vmem>> -> memref<10x10x128xf32, #tpu.memory_space<vmem>>
    %c0_46 = arith.constant 0 : index
    %c1 = arith.constant 1 : index
    %c0_47 = arith.constant 0 : index
    %104 = vector.load %103[%c0_46, %c1, %c0_47] : memref<10x10x128xf32, #tpu.memory_space<vmem>>, vector<10x4x128xf32>
    %105 = vector.extract_strided_slice %104 {offsets = [0, 0, 0], sizes = [4, 4, 128], strides = [1, 1, 1]} : vector<10x4x128xf32> to vector<4x4x128xf32>
    %106 = vector.extract_strided_slice %46 {offsets = [1, 0], sizes = [1, 128], strides = [1, 1]} : vector<49x128xf32> to vector<1x128xf32>
    %107 = vector.shape_cast %106 : vector<1x128xf32> to vector<128xf32>
    %108 = vector.shape_cast %107 : vector<128xf32> to vector<1x1x128xf32>
    %109 = vector.broadcast %108 : vector<1x1x128xf32> to vector<4x4x128xf32>
    %110 = arith.mulf %105, %109 : vector<4x4x128xf32>
    %111 = vector.extract_strided_slice %104 {offsets = [1, 0, 0], sizes = [4, 4, 128], strides = [1, 1, 1]} : vector<10x4x128xf32> to vector<4x4x128xf32>
    %112 = vector.extract_strided_slice %46 {offsets = [8, 0], sizes = [1, 128], strides = [1, 1]} : vector<49x128xf32> to vector<1x128xf32>
    %113 = vector.shape_cast %112 : vector<1x128xf32> to vector<128xf32>
    %114 = vector.shape_cast %113 : vector<128xf32> to vector<1x1x128xf32>
    %115 = vector.broadcast %114 : vector<1x1x128xf32> to vector<4x4x128xf32>
    %116 = arith.mulf %111, %115 : vector<4x4x128xf32>
    %117 = arith.addf %110, %116 : vector<4x4x128xf32>
    %118 = vector.extract_strided_slice %104 {offsets = [2, 0, 0], sizes = [4, 4, 128], strides = [1, 1, 1]} : vector<10x4x128xf32> to vector<4x4x128xf32>
    %119 = vector.extract_strided_slice %46 {offsets = [15, 0], sizes = [1, 128], strides = [1, 1]} : vector<49x128xf32> to vector<1x128xf32>
    %120 = vector.shape_cast %119 : vector<1x128xf32> to vector<128xf32>
    %121 = vector.shape_cast %120 : vector<128xf32> to vector<1x1x128xf32>
    %122 = vector.broadcast %121 : vector<1x1x128xf32> to vector<4x4x128xf32>
    %123 = arith.mulf %118, %122 : vector<4x4x128xf32>
    %124 = arith.addf %117, %123 : vector<4x4x128xf32>
    %125 = vector.extract_strided_slice %104 {offsets = [3, 0, 0], sizes = [4, 4, 128], strides = [1, 1, 1]} : vector<10x4x128xf32> to vector<4x4x128xf32>
    %126 = vector.extract_strided_slice %46 {offsets = [22, 0], sizes = [1, 128], strides = [1, 1]} : vector<49x128xf32> to vector<1x128xf32>
    %127 = vector.shape_cast %126 : vector<1x128xf32> to vector<128xf32>
    %128 = vector.shape_cast %127 : vector<128xf32> to vector<1x1x128xf32>
    %129 = vector.broadcast %128 : vector<1x1x128xf32> to vector<4x4x128xf32>
    %130 = arith.mulf %125, %129 : vector<4x4x128xf32>
    %131 = arith.addf %124, %130 : vector<4x4x128xf32>
    %132 = vector.extract_strided_slice %104 {offsets = [4, 0, 0], sizes = [4, 4, 128], strides = [1, 1, 1]} : vector<10x4x128xf32> to vector<4x4x128xf32>
    %133 = vector.extract_strided_slice %46 {offsets = [29, 0], sizes = [1, 128], strides = [1, 1]} : vector<49x128xf32> to vector<1x128xf32>
    %134 = vector.shape_cast %133 : vector<1x128xf32> to vector<128xf32>
    %135 = vector.shape_cast %134 : vector<128xf32> to vector<1x1x128xf32>
    %136 = vector.broadcast %135 : vector<1x1x128xf32> to vector<4x4x128xf32>
    %137 = arith.mulf %132, %136 : vector<4x4x128xf32>
    %138 = arith.addf %131, %137 : vector<4x4x128xf32>
    %139 = vector.extract_strided_slice %104 {offsets = [5, 0, 0], sizes = [4, 4, 128], strides = [1, 1, 1]} : vector<10x4x128xf32> to vector<4x4x128xf32>
    %140 = vector.extract_strided_slice %46 {offsets = [36, 0], sizes = [1, 128], strides = [1, 1]} : vector<49x128xf32> to vector<1x128xf32>
    %141 = vector.shape_cast %140 : vector<1x128xf32> to vector<128xf32>
    %142 = vector.shape_cast %141 : vector<128xf32> to vector<1x1x128xf32>
    %143 = vector.broadcast %142 : vector<1x1x128xf32> to vector<4x4x128xf32>
    %144 = arith.mulf %139, %143 : vector<4x4x128xf32>
    %145 = arith.addf %138, %144 : vector<4x4x128xf32>
    %146 = vector.extract_strided_slice %104 {offsets = [6, 0, 0], sizes = [4, 4, 128], strides = [1, 1, 1]} : vector<10x4x128xf32> to vector<4x4x128xf32>
    %147 = vector.extract_strided_slice %46 {offsets = [43, 0], sizes = [1, 128], strides = [1, 1]} : vector<49x128xf32> to vector<1x128xf32>
    %148 = vector.shape_cast %147 : vector<1x128xf32> to vector<128xf32>
    %149 = vector.shape_cast %148 : vector<128xf32> to vector<1x1x128xf32>
    %150 = vector.broadcast %149 : vector<1x1x128xf32> to vector<4x4x128xf32>
    %151 = arith.mulf %146, %150 : vector<4x4x128xf32>
    %152 = arith.addf %145, %151 : vector<4x4x128xf32>
    %153 = arith.addf %101, %152 : vector<4x4x128xf32>
    %c0_i32_48 = arith.constant 0 : i32
    %c0_i32_49 = arith.constant 0 : i32
    %c0_i32_50 = arith.constant 0 : i32
    %154 = tpu.memref_slice %arg7[%11, %c0_i32_48, %c0_i32_49, %c0_i32_50] : memref<2x10x10x128xf32, #tpu.memory_space<vmem>> -> memref<1x10x10x128xf32, #tpu.memory_space<vmem>>
    %155 = tpu.memref_squeeze %154 : memref<1x10x10x128xf32, #tpu.memory_space<vmem>> -> memref<10x10x128xf32, #tpu.memory_space<vmem>>
    %c0_51 = arith.constant 0 : index
    %c2 = arith.constant 2 : index
    %c0_52 = arith.constant 0 : index
    %156 = vector.load %155[%c0_51, %c2, %c0_52] : memref<10x10x128xf32, #tpu.memory_space<vmem>>, vector<10x4x128xf32>
    %157 = vector.extract_strided_slice %156 {offsets = [0, 0, 0], sizes = [4, 4, 128], strides = [1, 1, 1]} : vector<10x4x128xf32> to vector<4x4x128xf32>
    %158 = vector.extract_strided_slice %46 {offsets = [2, 0], sizes = [1, 128], strides = [1, 1]} : vector<49x128xf32> to vector<1x128xf32>
    %159 = vector.shape_cast %158 : vector<1x128xf32> to vector<128xf32>
    %160 = vector.shape_cast %159 : vector<128xf32> to vector<1x1x128xf32>
    %161 = vector.broadcast %160 : vector<1x1x128xf32> to vector<4x4x128xf32>
    %162 = arith.mulf %157, %161 : vector<4x4x128xf32>
    %163 = vector.extract_strided_slice %156 {offsets = [1, 0, 0], sizes = [4, 4, 128], strides = [1, 1, 1]} : vector<10x4x128xf32> to vector<4x4x128xf32>
    %164 = vector.extract_strided_slice %46 {offsets = [9, 0], sizes = [1, 128], strides = [1, 1]} : vector<49x128xf32> to vector<1x128xf32>
    %165 = vector.shape_cast %164 : vector<1x128xf32> to vector<128xf32>
    %166 = vector.shape_cast %165 : vector<128xf32> to vector<1x1x128xf32>
    %167 = vector.broadcast %166 : vector<1x1x128xf32> to vector<4x4x128xf32>
    %168 = arith.mulf %163, %167 : vector<4x4x128xf32>
    %169 = arith.addf %162, %168 : vector<4x4x128xf32>
    %170 = vector.extract_strided_slice %156 {offsets = [2, 0, 0], sizes = [4, 4, 128], strides = [1, 1, 1]} : vector<10x4x128xf32> to vector<4x4x128xf32>
    %171 = vector.extract_strided_slice %46 {offsets = [16, 0], sizes = [1, 128], strides = [1, 1]} : vector<49x128xf32> to vector<1x128xf32>
    %172 = vector.shape_cast %171 : vector<1x128xf32> to vector<128xf32>
    %173 = vector.shape_cast %172 : vector<128xf32> to vector<1x1x128xf32>
    %174 = vector.broadcast %173 : vector<1x1x128xf32> to vector<4x4x128xf32>
    %175 = arith.mulf %170, %174 : vector<4x4x128xf32>
    %176 = arith.addf %169, %175 : vector<4x4x128xf32>
    %177 = vector.extract_strided_slice %156 {offsets = [3, 0, 0], sizes = [4, 4, 128], strides = [1, 1, 1]} : vector<10x4x128xf32> to vector<4x4x128xf32>
    %178 = vector.extract_strided_slice %46 {offsets = [23, 0], sizes = [1, 128], strides = [1, 1]} : vector<49x128xf32> to vector<1x128xf32>
    %179 = vector.shape_cast %178 : vector<1x128xf32> to vector<128xf32>
    %180 = vector.shape_cast %179 : vector<128xf32> to vector<1x1x128xf32>
    %181 = vector.broadcast %180 : vector<1x1x128xf32> to vector<4x4x128xf32>
    %182 = arith.mulf %177, %181 : vector<4x4x128xf32>
    %183 = arith.addf %176, %182 : vector<4x4x128xf32>
    %184 = vector.extract_strided_slice %156 {offsets = [4, 0, 0], sizes = [4, 4, 128], strides = [1, 1, 1]} : vector<10x4x128xf32> to vector<4x4x128xf32>
    %185 = vector.extract_strided_slice %46 {offsets = [30, 0], sizes = [1, 128], strides = [1, 1]} : vector<49x128xf32> to vector<1x128xf32>
    %186 = vector.shape_cast %185 : vector<1x128xf32> to vector<128xf32>
    %187 = vector.shape_cast %186 : vector<128xf32> to vector<1x1x128xf32>
    %188 = vector.broadcast %187 : vector<1x1x128xf32> to vector<4x4x128xf32>
    %189 = arith.mulf %184, %188 : vector<4x4x128xf32>
    %190 = arith.addf %183, %189 : vector<4x4x128xf32>
    %191 = vector.extract_strided_slice %156 {offsets = [5, 0, 0], sizes = [4, 4, 128], strides = [1, 1, 1]} : vector<10x4x128xf32> to vector<4x4x128xf32>
    %192 = vector.extract_strided_slice %46 {offsets = [37, 0], sizes = [1, 128], strides = [1, 1]} : vector<49x128xf32> to vector<1x128xf32>
    %193 = vector.shape_cast %192 : vector<1x128xf32> to vector<128xf32>
    %194 = vector.shape_cast %193 : vector<128xf32> to vector<1x1x128xf32>
    %195 = vector.broadcast %194 : vector<1x1x128xf32> to vector<4x4x128xf32>
    %196 = arith.mulf %191, %195 : vector<4x4x128xf32>
    %197 = arith.addf %190, %196 : vector<4x4x128xf32>
    %198 = vector.extract_strided_slice %156 {offsets = [6, 0, 0], sizes = [4, 4, 128], strides = [1, 1, 1]} : vector<10x4x128xf32> to vector<4x4x128xf32>
    %199 = vector.extract_strided_slice %46 {offsets = [44, 0], sizes = [1, 128], strides = [1, 1]} : vector<49x128xf32> to vector<1x128xf32>
    %200 = vector.shape_cast %199 : vector<1x128xf32> to vector<128xf32>
    %201 = vector.shape_cast %200 : vector<128xf32> to vector<1x1x128xf32>
    %202 = vector.broadcast %201 : vector<1x1x128xf32> to vector<4x4x128xf32>
    %203 = arith.mulf %198, %202 : vector<4x4x128xf32>
    %204 = arith.addf %197, %203 : vector<4x4x128xf32>
    %205 = arith.addf %153, %204 : vector<4x4x128xf32>
    %c0_i32_53 = arith.constant 0 : i32
    %c0_i32_54 = arith.constant 0 : i32
    %c0_i32_55 = arith.constant 0 : i32
    %206 = tpu.memref_slice %arg7[%11, %c0_i32_53, %c0_i32_54, %c0_i32_55] : memref<2x10x10x128xf32, #tpu.memory_space<vmem>> -> memref<1x10x10x128xf32, #tpu.memory_space<vmem>>
    %207 = tpu.memref_squeeze %206 : memref<1x10x10x128xf32, #tpu.memory_space<vmem>> -> memref<10x10x128xf32, #tpu.memory_space<vmem>>
    %c0_56 = arith.constant 0 : index
    %c3 = arith.constant 3 : index
    %c0_57 = arith.constant 0 : index
    %208 = vector.load %207[%c0_56, %c3, %c0_57] : memref<10x10x128xf32, #tpu.memory_space<vmem>>, vector<10x4x128xf32>
    %209 = vector.extract_strided_slice %208 {offsets = [0, 0, 0], sizes = [4, 4, 128], strides = [1, 1, 1]} : vector<10x4x128xf32> to vector<4x4x128xf32>
    %210 = vector.extract_strided_slice %46 {offsets = [3, 0], sizes = [1, 128], strides = [1, 1]} : vector<49x128xf32> to vector<1x128xf32>
    %211 = vector.shape_cast %210 : vector<1x128xf32> to vector<128xf32>
    %212 = vector.shape_cast %211 : vector<128xf32> to vector<1x1x128xf32>
    %213 = vector.broadcast %212 : vector<1x1x128xf32> to vector<4x4x128xf32>
    %214 = arith.mulf %209, %213 : vector<4x4x128xf32>
    %215 = vector.extract_strided_slice %208 {offsets = [1, 0, 0], sizes = [4, 4, 128], strides = [1, 1, 1]} : vector<10x4x128xf32> to vector<4x4x128xf32>
    %216 = vector.extract_strided_slice %46 {offsets = [10, 0], sizes = [1, 128], strides = [1, 1]} : vector<49x128xf32> to vector<1x128xf32>
    %217 = vector.shape_cast %216 : vector<1x128xf32> to vector<128xf32>
    %218 = vector.shape_cast %217 : vector<128xf32> to vector<1x1x128xf32>
    %219 = vector.broadcast %218 : vector<1x1x128xf32> to vector<4x4x128xf32>
    %220 = arith.mulf %215, %219 : vector<4x4x128xf32>
    %221 = arith.addf %214, %220 : vector<4x4x128xf32>
    %222 = vector.extract_strided_slice %208 {offsets = [2, 0, 0], sizes = [4, 4, 128], strides = [1, 1, 1]} : vector<10x4x128xf32> to vector<4x4x128xf32>
    %223 = vector.extract_strided_slice %46 {offsets = [17, 0], sizes = [1, 128], strides = [1, 1]} : vector<49x128xf32> to vector<1x128xf32>
    %224 = vector.shape_cast %223 : vector<1x128xf32> to vector<128xf32>
    %225 = vector.shape_cast %224 : vector<128xf32> to vector<1x1x128xf32>
    %226 = vector.broadcast %225 : vector<1x1x128xf32> to vector<4x4x128xf32>
    %227 = arith.mulf %222, %226 : vector<4x4x128xf32>
    %228 = arith.addf %221, %227 : vector<4x4x128xf32>
    %229 = vector.extract_strided_slice %208 {offsets = [3, 0, 0], sizes = [4, 4, 128], strides = [1, 1, 1]} : vector<10x4x128xf32> to vector<4x4x128xf32>
    %230 = vector.extract_strided_slice %46 {offsets = [24, 0], sizes = [1, 128], strides = [1, 1]} : vector<49x128xf32> to vector<1x128xf32>
    %231 = vector.shape_cast %230 : vector<1x128xf32> to vector<128xf32>
    %232 = vector.shape_cast %231 : vector<128xf32> to vector<1x1x128xf32>
    %233 = vector.broadcast %232 : vector<1x1x128xf32> to vector<4x4x128xf32>
    %234 = arith.mulf %229, %233 : vector<4x4x128xf32>
    %235 = arith.addf %228, %234 : vector<4x4x128xf32>
    %236 = vector.extract_strided_slice %208 {offsets = [4, 0, 0], sizes = [4, 4, 128], strides = [1, 1, 1]} : vector<10x4x128xf32> to vector<4x4x128xf32>
    %237 = vector.extract_strided_slice %46 {offsets = [31, 0], sizes = [1, 128], strides = [1, 1]} : vector<49x128xf32> to vector<1x128xf32>
    %238 = vector.shape_cast %237 : vector<1x128xf32> to vector<128xf32>
    %239 = vector.shape_cast %238 : vector<128xf32> to vector<1x1x128xf32>
    %240 = vector.broadcast %239 : vector<1x1x128xf32> to vector<4x4x128xf32>
    %241 = arith.mulf %236, %240 : vector<4x4x128xf32>
    %242 = arith.addf %235, %241 : vector<4x4x128xf32>
    %243 = vector.extract_strided_slice %208 {offsets = [5, 0, 0], sizes = [4, 4, 128], strides = [1, 1, 1]} : vector<10x4x128xf32> to vector<4x4x128xf32>
    %244 = vector.extract_strided_slice %46 {offsets = [38, 0], sizes = [1, 128], strides = [1, 1]} : vector<49x128xf32> to vector<1x128xf32>
    %245 = vector.shape_cast %244 : vector<1x128xf32> to vector<128xf32>
    %246 = vector.shape_cast %245 : vector<128xf32> to vector<1x1x128xf32>
    %247 = vector.broadcast %246 : vector<1x1x128xf32> to vector<4x4x128xf32>
    %248 = arith.mulf %243, %247 : vector<4x4x128xf32>
    %249 = arith.addf %242, %248 : vector<4x4x128xf32>
    %250 = vector.extract_strided_slice %208 {offsets = [6, 0, 0], sizes = [4, 4, 128], strides = [1, 1, 1]} : vector<10x4x128xf32> to vector<4x4x128xf32>
    %251 = vector.extract_strided_slice %46 {offsets = [45, 0], sizes = [1, 128], strides = [1, 1]} : vector<49x128xf32> to vector<1x128xf32>
    %252 = vector.shape_cast %251 : vector<1x128xf32> to vector<128xf32>
    %253 = vector.shape_cast %252 : vector<128xf32> to vector<1x1x128xf32>
    %254 = vector.broadcast %253 : vector<1x1x128xf32> to vector<4x4x128xf32>
    %255 = arith.mulf %250, %254 : vector<4x4x128xf32>
    %256 = arith.addf %249, %255 : vector<4x4x128xf32>
    %257 = arith.addf %205, %256 : vector<4x4x128xf32>
    %c0_i32_58 = arith.constant 0 : i32
    %c0_i32_59 = arith.constant 0 : i32
    %c0_i32_60 = arith.constant 0 : i32
    %258 = tpu.memref_slice %arg7[%11, %c0_i32_58, %c0_i32_59, %c0_i32_60] : memref<2x10x10x128xf32, #tpu.memory_space<vmem>> -> memref<1x10x10x128xf32, #tpu.memory_space<vmem>>
    %259 = tpu.memref_squeeze %258 : memref<1x10x10x128xf32, #tpu.memory_space<vmem>> -> memref<10x10x128xf32, #tpu.memory_space<vmem>>
    %c0_61 = arith.constant 0 : index
    %c4 = arith.constant 4 : index
    %c0_62 = arith.constant 0 : index
    %260 = vector.load %259[%c0_61, %c4, %c0_62] : memref<10x10x128xf32, #tpu.memory_space<vmem>>, vector<10x4x128xf32>
    %261 = vector.extract_strided_slice %260 {offsets = [0, 0, 0], sizes = [4, 4, 128], strides = [1, 1, 1]} : vector<10x4x128xf32> to vector<4x4x128xf32>
    %262 = vector.extract_strided_slice %46 {offsets = [4, 0], sizes = [1, 128], strides = [1, 1]} : vector<49x128xf32> to vector<1x128xf32>
    %263 = vector.shape_cast %262 : vector<1x128xf32> to vector<128xf32>
    %264 = vector.shape_cast %263 : vector<128xf32> to vector<1x1x128xf32>
    %265 = vector.broadcast %264 : vector<1x1x128xf32> to vector<4x4x128xf32>
    %266 = arith.mulf %261, %265 : vector<4x4x128xf32>
    %267 = vector.extract_strided_slice %260 {offsets = [1, 0, 0], sizes = [4, 4, 128], strides = [1, 1, 1]} : vector<10x4x128xf32> to vector<4x4x128xf32>
    %268 = vector.extract_strided_slice %46 {offsets = [11, 0], sizes = [1, 128], strides = [1, 1]} : vector<49x128xf32> to vector<1x128xf32>
    %269 = vector.shape_cast %268 : vector<1x128xf32> to vector<128xf32>
    %270 = vector.shape_cast %269 : vector<128xf32> to vector<1x1x128xf32>
    %271 = vector.broadcast %270 : vector<1x1x128xf32> to vector<4x4x128xf32>
    %272 = arith.mulf %267, %271 : vector<4x4x128xf32>
    %273 = arith.addf %266, %272 : vector<4x4x128xf32>
    %274 = vector.extract_strided_slice %260 {offsets = [2, 0, 0], sizes = [4, 4, 128], strides = [1, 1, 1]} : vector<10x4x128xf32> to vector<4x4x128xf32>
    %275 = vector.extract_strided_slice %46 {offsets = [18, 0], sizes = [1, 128], strides = [1, 1]} : vector<49x128xf32> to vector<1x128xf32>
    %276 = vector.shape_cast %275 : vector<1x128xf32> to vector<128xf32>
    %277 = vector.shape_cast %276 : vector<128xf32> to vector<1x1x128xf32>
    %278 = vector.broadcast %277 : vector<1x1x128xf32> to vector<4x4x128xf32>
    %279 = arith.mulf %274, %278 : vector<4x4x128xf32>
    %280 = arith.addf %273, %279 : vector<4x4x128xf32>
    %281 = vector.extract_strided_slice %260 {offsets = [3, 0, 0], sizes = [4, 4, 128], strides = [1, 1, 1]} : vector<10x4x128xf32> to vector<4x4x128xf32>
    %282 = vector.extract_strided_slice %46 {offsets = [25, 0], sizes = [1, 128], strides = [1, 1]} : vector<49x128xf32> to vector<1x128xf32>
    %283 = vector.shape_cast %282 : vector<1x128xf32> to vector<128xf32>
    %284 = vector.shape_cast %283 : vector<128xf32> to vector<1x1x128xf32>
    %285 = vector.broadcast %284 : vector<1x1x128xf32> to vector<4x4x128xf32>
    %286 = arith.mulf %281, %285 : vector<4x4x128xf32>
    %287 = arith.addf %280, %286 : vector<4x4x128xf32>
    %288 = vector.extract_strided_slice %260 {offsets = [4, 0, 0], sizes = [4, 4, 128], strides = [1, 1, 1]} : vector<10x4x128xf32> to vector<4x4x128xf32>
    %289 = vector.extract_strided_slice %46 {offsets = [32, 0], sizes = [1, 128], strides = [1, 1]} : vector<49x128xf32> to vector<1x128xf32>
    %290 = vector.shape_cast %289 : vector<1x128xf32> to vector<128xf32>
    %291 = vector.shape_cast %290 : vector<128xf32> to vector<1x1x128xf32>
    %292 = vector.broadcast %291 : vector<1x1x128xf32> to vector<4x4x128xf32>
    %293 = arith.mulf %288, %292 : vector<4x4x128xf32>
    %294 = arith.addf %287, %293 : vector<4x4x128xf32>
    %295 = vector.extract_strided_slice %260 {offsets = [5, 0, 0], sizes = [4, 4, 128], strides = [1, 1, 1]} : vector<10x4x128xf32> to vector<4x4x128xf32>
    %296 = vector.extract_strided_slice %46 {offsets = [39, 0], sizes = [1, 128], strides = [1, 1]} : vector<49x128xf32> to vector<1x128xf32>
    %297 = vector.shape_cast %296 : vector<1x128xf32> to vector<128xf32>
    %298 = vector.shape_cast %297 : vector<128xf32> to vector<1x1x128xf32>
    %299 = vector.broadcast %298 : vector<1x1x128xf32> to vector<4x4x128xf32>
    %300 = arith.mulf %295, %299 : vector<4x4x128xf32>
    %301 = arith.addf %294, %300 : vector<4x4x128xf32>
    %302 = vector.extract_strided_slice %260 {offsets = [6, 0, 0], sizes = [4, 4, 128], strides = [1, 1, 1]} : vector<10x4x128xf32> to vector<4x4x128xf32>
    %303 = vector.extract_strided_slice %46 {offsets = [46, 0], sizes = [1, 128], strides = [1, 1]} : vector<49x128xf32> to vector<1x128xf32>
    %304 = vector.shape_cast %303 : vector<1x128xf32> to vector<128xf32>
    %305 = vector.shape_cast %304 : vector<128xf32> to vector<1x1x128xf32>
    %306 = vector.broadcast %305 : vector<1x1x128xf32> to vector<4x4x128xf32>
    %307 = arith.mulf %302, %306 : vector<4x4x128xf32>
    %308 = arith.addf %301, %307 : vector<4x4x128xf32>
    %309 = arith.addf %257, %308 : vector<4x4x128xf32>
    %c0_i32_63 = arith.constant 0 : i32
    %c0_i32_64 = arith.constant 0 : i32
    %c0_i32_65 = arith.constant 0 : i32
    %310 = tpu.memref_slice %arg7[%11, %c0_i32_63, %c0_i32_64, %c0_i32_65] : memref<2x10x10x128xf32, #tpu.memory_space<vmem>> -> memref<1x10x10x128xf32, #tpu.memory_space<vmem>>
    %311 = tpu.memref_squeeze %310 : memref<1x10x10x128xf32, #tpu.memory_space<vmem>> -> memref<10x10x128xf32, #tpu.memory_space<vmem>>
    %c0_66 = arith.constant 0 : index
    %c5 = arith.constant 5 : index
    %c0_67 = arith.constant 0 : index
    %312 = vector.load %311[%c0_66, %c5, %c0_67] : memref<10x10x128xf32, #tpu.memory_space<vmem>>, vector<10x4x128xf32>
    %313 = vector.extract_strided_slice %312 {offsets = [0, 0, 0], sizes = [4, 4, 128], strides = [1, 1, 1]} : vector<10x4x128xf32> to vector<4x4x128xf32>
    %314 = vector.extract_strided_slice %46 {offsets = [5, 0], sizes = [1, 128], strides = [1, 1]} : vector<49x128xf32> to vector<1x128xf32>
    %315 = vector.shape_cast %314 : vector<1x128xf32> to vector<128xf32>
    %316 = vector.shape_cast %315 : vector<128xf32> to vector<1x1x128xf32>
    %317 = vector.broadcast %316 : vector<1x1x128xf32> to vector<4x4x128xf32>
    %318 = arith.mulf %313, %317 : vector<4x4x128xf32>
    %319 = vector.extract_strided_slice %312 {offsets = [1, 0, 0], sizes = [4, 4, 128], strides = [1, 1, 1]} : vector<10x4x128xf32> to vector<4x4x128xf32>
    %320 = vector.extract_strided_slice %46 {offsets = [12, 0], sizes = [1, 128], strides = [1, 1]} : vector<49x128xf32> to vector<1x128xf32>
    %321 = vector.shape_cast %320 : vector<1x128xf32> to vector<128xf32>
    %322 = vector.shape_cast %321 : vector<128xf32> to vector<1x1x128xf32>
    %323 = vector.broadcast %322 : vector<1x1x128xf32> to vector<4x4x128xf32>
    %324 = arith.mulf %319, %323 : vector<4x4x128xf32>
    %325 = arith.addf %318, %324 : vector<4x4x128xf32>
    %326 = vector.extract_strided_slice %312 {offsets = [2, 0, 0], sizes = [4, 4, 128], strides = [1, 1, 1]} : vector<10x4x128xf32> to vector<4x4x128xf32>
    %327 = vector.extract_strided_slice %46 {offsets = [19, 0], sizes = [1, 128], strides = [1, 1]} : vector<49x128xf32> to vector<1x128xf32>
    %328 = vector.shape_cast %327 : vector<1x128xf32> to vector<128xf32>
    %329 = vector.shape_cast %328 : vector<128xf32> to vector<1x1x128xf32>
    %330 = vector.broadcast %329 : vector<1x1x128xf32> to vector<4x4x128xf32>
    %331 = arith.mulf %326, %330 : vector<4x4x128xf32>
    %332 = arith.addf %325, %331 : vector<4x4x128xf32>
    %333 = vector.extract_strided_slice %312 {offsets = [3, 0, 0], sizes = [4, 4, 128], strides = [1, 1, 1]} : vector<10x4x128xf32> to vector<4x4x128xf32>
    %334 = vector.extract_strided_slice %46 {offsets = [26, 0], sizes = [1, 128], strides = [1, 1]} : vector<49x128xf32> to vector<1x128xf32>
    %335 = vector.shape_cast %334 : vector<1x128xf32> to vector<128xf32>
    %336 = vector.shape_cast %335 : vector<128xf32> to vector<1x1x128xf32>
    %337 = vector.broadcast %336 : vector<1x1x128xf32> to vector<4x4x128xf32>
    %338 = arith.mulf %333, %337 : vector<4x4x128xf32>
    %339 = arith.addf %332, %338 : vector<4x4x128xf32>
    %340 = vector.extract_strided_slice %312 {offsets = [4, 0, 0], sizes = [4, 4, 128], strides = [1, 1, 1]} : vector<10x4x128xf32> to vector<4x4x128xf32>
    %341 = vector.extract_strided_slice %46 {offsets = [33, 0], sizes = [1, 128], strides = [1, 1]} : vector<49x128xf32> to vector<1x128xf32>
    %342 = vector.shape_cast %341 : vector<1x128xf32> to vector<128xf32>
    %343 = vector.shape_cast %342 : vector<128xf32> to vector<1x1x128xf32>
    %344 = vector.broadcast %343 : vector<1x1x128xf32> to vector<4x4x128xf32>
    %345 = arith.mulf %340, %344 : vector<4x4x128xf32>
    %346 = arith.addf %339, %345 : vector<4x4x128xf32>
    %347 = vector.extract_strided_slice %312 {offsets = [5, 0, 0], sizes = [4, 4, 128], strides = [1, 1, 1]} : vector<10x4x128xf32> to vector<4x4x128xf32>
    %348 = vector.extract_strided_slice %46 {offsets = [40, 0], sizes = [1, 128], strides = [1, 1]} : vector<49x128xf32> to vector<1x128xf32>
    %349 = vector.shape_cast %348 : vector<1x128xf32> to vector<128xf32>
    %350 = vector.shape_cast %349 : vector<128xf32> to vector<1x1x128xf32>
    %351 = vector.broadcast %350 : vector<1x1x128xf32> to vector<4x4x128xf32>
    %352 = arith.mulf %347, %351 : vector<4x4x128xf32>
    %353 = arith.addf %346, %352 : vector<4x4x128xf32>
    %354 = vector.extract_strided_slice %312 {offsets = [6, 0, 0], sizes = [4, 4, 128], strides = [1, 1, 1]} : vector<10x4x128xf32> to vector<4x4x128xf32>
    %355 = vector.extract_strided_slice %46 {offsets = [47, 0], sizes = [1, 128], strides = [1, 1]} : vector<49x128xf32> to vector<1x128xf32>
    %356 = vector.shape_cast %355 : vector<1x128xf32> to vector<128xf32>
    %357 = vector.shape_cast %356 : vector<128xf32> to vector<1x1x128xf32>
    %358 = vector.broadcast %357 : vector<1x1x128xf32> to vector<4x4x128xf32>
    %359 = arith.mulf %354, %358 : vector<4x4x128xf32>
    %360 = arith.addf %353, %359 : vector<4x4x128xf32>
    %361 = arith.addf %309, %360 : vector<4x4x128xf32>
    %c0_i32_68 = arith.constant 0 : i32
    %c0_i32_69 = arith.constant 0 : i32
    %c0_i32_70 = arith.constant 0 : i32
    %362 = tpu.memref_slice %arg7[%11, %c0_i32_68, %c0_i32_69, %c0_i32_70] : memref<2x10x10x128xf32, #tpu.memory_space<vmem>> -> memref<1x10x10x128xf32, #tpu.memory_space<vmem>>
    %363 = tpu.memref_squeeze %362 : memref<1x10x10x128xf32, #tpu.memory_space<vmem>> -> memref<10x10x128xf32, #tpu.memory_space<vmem>>
    %c0_71 = arith.constant 0 : index
    %c6 = arith.constant 6 : index
    %c0_72 = arith.constant 0 : index
    %364 = vector.load %363[%c0_71, %c6, %c0_72] : memref<10x10x128xf32, #tpu.memory_space<vmem>>, vector<10x4x128xf32>
    %365 = vector.extract_strided_slice %364 {offsets = [0, 0, 0], sizes = [4, 4, 128], strides = [1, 1, 1]} : vector<10x4x128xf32> to vector<4x4x128xf32>
    %366 = vector.extract_strided_slice %46 {offsets = [6, 0], sizes = [1, 128], strides = [1, 1]} : vector<49x128xf32> to vector<1x128xf32>
    %367 = vector.shape_cast %366 : vector<1x128xf32> to vector<128xf32>
    %368 = vector.shape_cast %367 : vector<128xf32> to vector<1x1x128xf32>
    %369 = vector.broadcast %368 : vector<1x1x128xf32> to vector<4x4x128xf32>
    %370 = arith.mulf %365, %369 : vector<4x4x128xf32>
    %371 = vector.extract_strided_slice %364 {offsets = [1, 0, 0], sizes = [4, 4, 128], strides = [1, 1, 1]} : vector<10x4x128xf32> to vector<4x4x128xf32>
    %372 = vector.extract_strided_slice %46 {offsets = [13, 0], sizes = [1, 128], strides = [1, 1]} : vector<49x128xf32> to vector<1x128xf32>
    %373 = vector.shape_cast %372 : vector<1x128xf32> to vector<128xf32>
    %374 = vector.shape_cast %373 : vector<128xf32> to vector<1x1x128xf32>
    %375 = vector.broadcast %374 : vector<1x1x128xf32> to vector<4x4x128xf32>
    %376 = arith.mulf %371, %375 : vector<4x4x128xf32>
    %377 = arith.addf %370, %376 : vector<4x4x128xf32>
    %378 = vector.extract_strided_slice %364 {offsets = [2, 0, 0], sizes = [4, 4, 128], strides = [1, 1, 1]} : vector<10x4x128xf32> to vector<4x4x128xf32>
    %379 = vector.extract_strided_slice %46 {offsets = [20, 0], sizes = [1, 128], strides = [1, 1]} : vector<49x128xf32> to vector<1x128xf32>
    %380 = vector.shape_cast %379 : vector<1x128xf32> to vector<128xf32>
    %381 = vector.shape_cast %380 : vector<128xf32> to vector<1x1x128xf32>
    %382 = vector.broadcast %381 : vector<1x1x128xf32> to vector<4x4x128xf32>
    %383 = arith.mulf %378, %382 : vector<4x4x128xf32>
    %384 = arith.addf %377, %383 : vector<4x4x128xf32>
    %385 = vector.extract_strided_slice %364 {offsets = [3, 0, 0], sizes = [4, 4, 128], strides = [1, 1, 1]} : vector<10x4x128xf32> to vector<4x4x128xf32>
    %386 = vector.extract_strided_slice %46 {offsets = [27, 0], sizes = [1, 128], strides = [1, 1]} : vector<49x128xf32> to vector<1x128xf32>
    %387 = vector.shape_cast %386 : vector<1x128xf32> to vector<128xf32>
    %388 = vector.shape_cast %387 : vector<128xf32> to vector<1x1x128xf32>
    %389 = vector.broadcast %388 : vector<1x1x128xf32> to vector<4x4x128xf32>
    %390 = arith.mulf %385, %389 : vector<4x4x128xf32>
    %391 = arith.addf %384, %390 : vector<4x4x128xf32>
    %392 = vector.extract_strided_slice %364 {offsets = [4, 0, 0], sizes = [4, 4, 128], strides = [1, 1, 1]} : vector<10x4x128xf32> to vector<4x4x128xf32>
    %393 = vector.extract_strided_slice %46 {offsets = [34, 0], sizes = [1, 128], strides = [1, 1]} : vector<49x128xf32> to vector<1x128xf32>
    %394 = vector.shape_cast %393 : vector<1x128xf32> to vector<128xf32>
    %395 = vector.shape_cast %394 : vector<128xf32> to vector<1x1x128xf32>
    %396 = vector.broadcast %395 : vector<1x1x128xf32> to vector<4x4x128xf32>
    %397 = arith.mulf %392, %396 : vector<4x4x128xf32>
    %398 = arith.addf %391, %397 : vector<4x4x128xf32>
    %399 = vector.extract_strided_slice %364 {offsets = [5, 0, 0], sizes = [4, 4, 128], strides = [1, 1, 1]} : vector<10x4x128xf32> to vector<4x4x128xf32>
    %400 = vector.extract_strided_slice %46 {offsets = [41, 0], sizes = [1, 128], strides = [1, 1]} : vector<49x128xf32> to vector<1x128xf32>
    %401 = vector.shape_cast %400 : vector<1x128xf32> to vector<128xf32>
    %402 = vector.shape_cast %401 : vector<128xf32> to vector<1x1x128xf32>
    %403 = vector.broadcast %402 : vector<1x1x128xf32> to vector<4x4x128xf32>
    %404 = arith.mulf %399, %403 : vector<4x4x128xf32>
    %405 = arith.addf %398, %404 : vector<4x4x128xf32>
    %406 = vector.extract_strided_slice %364 {offsets = [6, 0, 0], sizes = [4, 4, 128], strides = [1, 1, 1]} : vector<10x4x128xf32> to vector<4x4x128xf32>
    %407 = vector.extract_strided_slice %46 {offsets = [48, 0], sizes = [1, 128], strides = [1, 1]} : vector<49x128xf32> to vector<1x128xf32>
    %408 = vector.shape_cast %407 : vector<1x128xf32> to vector<128xf32>
    %409 = vector.shape_cast %408 : vector<128xf32> to vector<1x1x128xf32>
    %410 = vector.broadcast %409 : vector<1x1x128xf32> to vector<4x4x128xf32>
    %411 = arith.mulf %406, %410 : vector<4x4x128xf32>
    %412 = arith.addf %405, %411 : vector<4x4x128xf32>
    %413 = arith.addf %361, %412 : vector<4x4x128xf32>
    %c0_73 = arith.constant 0 : index
    %c0_74 = arith.constant 0 : index
    %c0_75 = arith.constant 0 : index
    %c0_76 = arith.constant 0 : index
    %414 = vector.load %arg6[%c0_73, %c0_74, %c0_75, %c0_76] : memref<1x4x4x128xf32, #tpu.memory_space<vmem>>, vector<1x4x4x128xf32>
    %415 = vector.shape_cast %414 : vector<1x4x4x128xf32> to vector<4x4x128xf32>
    %416 = vector.shape_cast %413 : vector<4x4x128xf32> to vector<1x4x4x128xf32>
    tpu.vector_store %arg6[%c0_73, %c0_74, %c0_75, %c0_76], %416 {strides = array<i32>} : memref<1x4x4x128xf32, #tpu.memory_space<vmem>>, vector<1x4x4x128xf32>,
    return
  }
  func.func @transform_1(%arg0: i32, %arg1: i32, %arg2: i32) -> (i32, i32) {
    %c0_i32 = arith.constant 0 : i32
    %c0_i32_0 = arith.constant 0 : i32
    %c0_i32_1 = arith.constant 0 : i32
    return %c0_i32, %c0_i32_0 : i32, i32
  }
  func.func @transform_2(%arg0: i32, %arg1: i32, %arg2: i32) -> (i32, i32) {
    %c0_i32 = arith.constant 0 : i32
    %c0_i32_0 = arith.constant 0 : i32
    %c0_i32_1 = arith.constant 0 : i32
    return %c0_i32, %c0_i32_0 : i32, i32
  }
  func.func @transform_3(%arg0: i32, %arg1: i32, %arg2: i32) -> (i32, i32, i32, i32) {
    %c1_i32 = arith.constant 1 : i32
    %0 = arith.muli %arg1, %c1_i32 : i32
    %1 = arith.addi %0, %arg2 : i32
    %c0_i32 = arith.constant 0 : i32
    %c0_i32_0 = arith.constant 0 : i32
    %c0_i32_1 = arith.constant 0 : i32
    return %arg0, %1, %c0_i32, %c0_i32_0 : i32, i32, i32, i32
  }
}

</mosaic_0001>

<bundles_post_ra>
// kernel: tpu_custom_call.1
= control target key start
LH: loop header
LB: loop body
LE: loop exit
PB: predicated region body
PF: predicated region fallthrough
CT: control target
= control target key end

     0   :  { %8 = vsyncpa [#allocation5], 0  ;;  %s2285_s0 = inlined_call_operand.hbm [shape: f32[2,4,4,128], index: 0, kind: input, shape index: {}]   ;;  %s2286_s1 = inlined_call_operand.hbm [shape: f32[49,128], index: 1, kind: input, shape index: {}]   ;;  %s2287_s2 = inlined_call_operand.vmem [shape: f32[1,128], index: 2, kind: input, shape index: {}]   ;;  %s2288_s3 = inlined_call_operand.hbm [shape: f32[2,4,4,128], index: 3, kind: output, shape index: {}]  }
   0x1   :  { %9 = vsyncpa [#allocation6], 0 }
   0x2   :  { %11 = vsyncpa [#allocation6 + $0x1], 0  ;;  %s1388_s12 = smov 0   ;;  %s1390_s13 = smov 0  }
   0x3   :  { %s1392_s14 = smov 0   ;;  %s1394_s15 = smov 0  }
   0x4   :  { %s1396_s16 = smov 0   ;;  %s1398_s17 = smov 0  }
   0x5 LB: > { %s1110_s18 = sadd.s32 4294967295, %s1358_s17   ;;  %s1111_s19 = sadd.s32 4294967294, %s1358_s17   ;;  %s1358_s17 = sphi %s1398_s17, %s17_s17   ;;  %s1354_s16 = sphi %s1396_s16, %s2708_s16   ;;  %s1350_s15 = sphi %s1394_s15, %s2707_s15   ;;  %s1346_s14 = sphi %s1392_s14, %s2706_s14   ;;  %s1342_s13 = sphi %s1390_s13, %s2705_s13   ;;  %s1338_s12 = sphi %s1388_s12, %s2704_s12  }
   0x6   : > { %s36_s20 = sadd.s32 1, %s1354_s16  ;;  %s89_s21 = sadd.s32 1, %s1346_s14 }
   0x7   : > { %p38_p0 = scmp.ge.s32.totalorder %s36_s20, 2  ;;  %p99_p1 = scmp.ne.s32.totalorder %s1346_s14, %s1342_s13 }
   0x8   : > { %p100_p2 = scmp.eq.s32.totalorder %s1110_s18, 1  ;;  %p105_p3 = scmp.ne.s32.totalorder %s1342_s13, %s1338_s12 }
   0x9   : > { %s2710_s20 = smov (%p38_p0, %s36_s20), 0  ;;  %p106_p5 = scmp.eq.s32.totalorder %s1111_s19, 1 }
   0xa   : > { %p1428_p4 = por %p100_p2, %p99_p1  ;;  %s84_s23 = ssub.s32 %s1354_s16, %s2710_s20 }
   0xb   : > { %p1112_p6 = scmp.ge.s32.totalorder %s1358_s17, 1  ;;  %p87_p7 = scmp.eq.s32.totalorder %s84_s23, 0 }
   0xc   : > { %p1435_p8 = por %p106_p5, %p105_p3  ;;  %p113_p9 = scmp.lt.s32.totalorder %s1358_s17, 3 }
   0xd   : > { %s1441_s25 = scalar_select %p87_p7, %s1346_s14, %s89_s21  }
   0xe   : > { %p114_p10 = pnand %p1112_p6, %p113_p9  ;;  %p1159_p11 = scmp.eq.s32.totalorder %s1110_s18, 0 }
   0xf   : > { %s124_s28 = sshll.u32 %s2286_s1, 4  ;;  %s1360_s29 = smov [#allocation4]   ;;  %s125_s28 = int_to_ptr.hbm [resolvable:$true] %s124_s28 }
  0x10   : > { %p1151_p12 = pneg %p114_p10  ;;  %s126_s30 = sshll.u32 %s1360_s29, 4  ;;  %s127_s30 = int_to_ptr.vmem [resolvable:$true] %s126_s30 }
  0x11   : > { %s1361_s4 = smov 128   ;;  %s1362_s5 = smov 8  }
  0x12   : > { %p1152_p13 = pnand %p1159_p11, %p1151_p12  ;;  %145 = sbr.rel (%p114_p10) target bundleno = 247 (0xf7), region = 28 }
  0x14   : > { %1154 = dma.hbm_to_vmem [thread:$0]  (!%p1152_p13), %s125_s28, 896, %s127_s30, [#allocation5], %s1361_s4, %s1361_s4, %s1362_s5  }
  0x17   : > { %1327 = dma.done.wait (%p1159_p11), [#allocation5], 896  }
  0x18   : > { %1329 = vsyncadd (%p1159_p11), [#allocation5], 4294966400  ;;  %s160_s6 = sand.u32 1, %s1342_s13   ;;  %s1117_s7 = sshll.u32 %s1350_s15, 4 }
  0x19   : > { %s1116_s8 = sshll.u32 %s160_s6, 4  ;;  %s186_s11 = scalar_lea.hbm %s2285_s0, %s1117_s7 }
  0x1a   : > { %s1363_s18 = smov [#allocation2]   ;;  %s192_s21 = sshll.u32 %s186_s11, 4  ;;  %s193_s21 = int_to_ptr.hbm [resolvable:$true] %s192_s21 }
  0x1b   : > { %s993_s19 = scalar_lea.vmem %s1363_s18, 51  ;;  %s1250_s26 = sshra.s32 %s193_s21, 4  ;;  %s1251_s26 = int_to_ptr.hbm [resolvable:$true] %s1250_s26 }
  0x1c   : > { %s194_s23 = sshll.u32 %s993_s19, 4  ;;  %s1252_s27 = scalar_lea.hbm %s1251_s26, 16  ;;  %s195_s23 = int_to_ptr.vmem [resolvable:$true] %s194_s23 }
  0x1d   : > { %p1253_p0 = scmp.ne.s32.totalorder %s1251_s26, %s1252_s27  ;;  %s1254_s30 = scalar_lea.hbm %s2285_s0, 32 }
  0x1e   : > { %p1255_p1 = scmp.lt.s32.totalorder %s1251_s26, %s2285_s0  ;;  %p1256_p2 = scmp.lt.s32.totalorder %s1254_s30, %s1252_s27 }
  0x20   : > { %p1257_p3 = por %p1256_p2, %p1255_p1 }
  0x22   : > { %p1258_p5 = pnand %p1257_p3, %p1253_p0 }
  0x24   : > { %1261 = shalt.err (!%p1258_p5)  }
  0x25   : > { %s1364_s9 = smov 64   ;;  %s1365_s10 = smov 256  }
  0x26   : > { %s1366_s11 = smov 4   ;;  %s1463_s18 = scalar_lea.vmem [#allocation7], %s1116_s8 }
  0x27   : > { %199 = dma.hbm_to_vmem [thread:$0]  %s193_s21, 256, %s195_s23, [#allocation3], %s1364_s9, %s1365_s10, %s1366_s11 }
  0x28   : > { %1330 = dma.done.wait [#allocation3], 256 }
  0x29   : > { %1331 = vsyncadd [#allocation3], 4294967040  ;;  %v1367_v0 = vmov 0.0   ;;  %v1472_v1 = vld [vmem:[#allocation4] sm:$0xff]  ;;  %v1475_v2 = vld [vmem:[#allocation4 + $0x8] sm:$0xff]  ;;  %s911_s26 = scalar_lea.hbm %s2288_s3, %s1117_s7  ;;  %s912_s27 = sshll.u32 %s1463_s18, 4  ;;  %s913_s27 = int_to_ptr.vmem [resolvable:$true] %s912_s27 }
  0x2a   : > { %333 = vst [vmem:[#allocation2] sm:$0x7] %v1367_v0  ;;  %v1477_v3 = vld [vmem:[#allocation4 + $0x10] sm:$0xff]  ;;  %v1479_v4 = vld [vmem:[#allocation4 + $0x18] sm:$0xff]  ;;  %v1483_v5 = vld [vmem:[#allocation4 + $0x20] sm:$0xff]  ;;  %v1489_v7 = vperm.slane %v1472_v1, 0 }
  0x2b   : > { %334 = vst [vmem:[#allocation2 + $0x10] sm:$0x7] %v1367_v0  ;;  %v1485_v6 = vld [vmem:[#allocation4 + $0x28] sm:$0xff]  ;;  %v1493_v8 = vperm.slane %v1472_v1, 7  ;;  %v1496_v9 = vperm.slane %v1475_v2, 6  ;;  %v1499_v10 = vperm.slane %v1477_v3, 5 }
  0x2c   : > { %335 = vst [vmem:[#allocation2 + $0x20] sm:$0x7] %v1367_v0  ;;  %v1502_v11 = vperm.slane %v1479_v4, 4  ;;  %v1510_v14 = vperm.slane %v1483_v5, 3  ;;  %v1513_v15 = vperm.slane %v1485_v6, 2  ;;  %v1531_v22 = vperm.slane %v1472_v1, 1 }
  0x2d   : > { %336 = vst [vmem:[#allocation2 + $0x30] sm:$0x7] %v1367_v0  ;;  %v1534_v23 = vperm.slane %v1477_v3, 6  ;;  %v1538_v24 = vperm.slane %v1475_v2, 0  ;;  %v1541_v25 = vperm.slane %v1479_v4, 5  ;;  %v1544_v26 = vperm.slane %v1483_v5, 4 }
  0x2e   : > { %337 = vst [vmem:[#allocation2 + $0x40] sm:$0x7] %v1367_v0  ;;  %v1547_v27 = vperm.slane %v1485_v6, 3  ;;  %v1559_v30 = vperm.slane %v1475_v2, 7  ;;  %v1564_v32 = vperm.slane %v1472_v1, 2  ;;  %v1599_v42 = vperm.slane %v1477_v3, 7 }
  0x2f   : > { %338 = vst [vmem:[#allocation2 + $0x50] sm:$0x7] %v1367_v0  ;;  %v1602_v43 = vperm.slane %v1479_v4, 6  ;;  %v1606_v44 = vperm.slane %v1475_v2, 1  ;;  %v1609_v45 = vperm.slane %v1477_v3, 0  ;;  %v1612_v46 = vperm.slane %v1483_v5, 5 }
  0x30   : > { %339 = vst [vmem:[#allocation2 + $0x60] sm:$0x7] %v1367_v0  ;;  %v1615_v47 = vperm.slane %v1485_v6, 4  ;;  %v1627_v50 = vperm.slane %v1472_v1, 3  ;;  %v1642_v54 = vld [vmem:[#allocation2 + $0x33] sm:$0xf] }
  0x31   : > { %340 = vst [vmem:[#allocation2 + $0x70] sm:$0x7] %v1367_v0  ;;  %v1654_v57 = vperm.slane %v1475_v2, 2  ;;  %v1657_v58 = vperm.slane %v1477_v3, 1  ;;  %v1660_v59 = vperm.slane %v1479_v4, 0  ;;  %v1663_v60 = vperm.slane %v1479_v4, 7 }
  0x32   : > { %341 = vst [vmem:[#allocation2 + $0x80] sm:$0x7] %v1367_v0  ;;  %v1666_v61 = vld [vmem:[#allocation2 + $0x43] sm:$0xf]  ;;  %v1669_v62 = vperm.slane %v1483_v5, 6  ;;  %v1672_v63 = vperm.slane %v1485_v6, 5 }
  0x33   : > { %342 = vst [vmem:[#allocation2 + $0x90] sm:$0x7] %v1367_v0  ;;  %s914_s28 = sshll.u32 %s911_s26, 4  ;;  %s897_s29 = scalar_lea.sflag [#allocation6], %s160_s6  ;;  %s915_s28 = int_to_ptr.hbm [resolvable:$true] %s914_s28 }
  0x34   : > { %343 = vst [vmem:[#allocation2 + $0x7] sm:$0x7] %v1367_v0  ;;  %v1505_v12 = vld [vmem:[#allocation2 + $0x30] sm:$0xf]  ;;  %s1288_s30 = sshra.s32 %s915_s28, 4  ;;  %s1294_s5 = scalar_lea.hbm %s2288_s3, 32  ;;  %s1289_s30 = int_to_ptr.hbm [resolvable:$true] %s1288_s30 }
  0x35   : > { %2446 = vst [vmem:[#allocation17_spill] sm:$0xff] %v1489_v7  ;;  %v1507_v13 = vld [vmem:[#allocation2 + $0x40] sm:$0xf]  ;;  %v1520_v18 = vld [vmem:[#allocation2 + $0x31] sm:$0xf]  ;;  %v1552_v28 = vmul.f32 %v1499_v10, %v1505_v12  ;;  %v1631_v51 = vmul.f32 %v1496_v9, %v1505_v12  ;;  %s1290_s15 = scalar_lea.hbm %s1289_s30, 16  ;;  %p1295_p10 = scmp.lt.s32.totalorder %s1289_s30, %s2288_s3 }
  0x36   : > { %344 = vst [vmem:[#allocation2 + $0x17] sm:$0x7] %v1367_v0  ;;  %v1516_v16 = vld [vmem:[#allocation2 + $0x50] sm:$0xf]  ;;  %v1523_v19 = vld [vmem:[#allocation2 + $0x41] sm:$0xf]  ;;  %v1556_v29 = vmul.f32 %v1502_v11, %v1507_v13  ;;  %v1577_v35 = vmul.f32 %v1534_v23, %v1520_v18  ;;  %v1646_v55 = vmul.f32 %v1499_v10, %v1507_v13  ;;  %p1291_p6 = scmp.ne.s32.totalorder %s1289_s30, %s1290_s15  ;;  %p1296_p11 = scmp.lt.s32.totalorder %s1294_s5, %s1290_s15 }
  0x37   : > { %2447 = vst [vmem:[#allocation18_spill] sm:$0xff] %v1493_v8  ;;  %v1518_v17 = vld [vmem:[#allocation2 + $0x60] sm:$0xf]  ;;  %v1525_v20 = vld [vmem:[#allocation2 + $0x51] sm:$0xf]  ;;  %v1569_v33 = vmul.f32 %v1510_v14, %v1516_v16  ;;  %v1581_v36 = vmul.f32 %v1541_v25, %v1523_v19  ;;  %v1650_v56 = vmul.f32 %v1502_v11, %v1516_v16 }
  0x38   : > { %2448 = vst [vmem:[#allocation19_spill] sm:$0xff] %v1496_v9  ;;  %v1528_v21 = vld [vmem:[#allocation2 + $0x61] sm:$0xf]  ;;  %v1561_v31 = vld [vmem:[#allocation2 + $0x32] sm:$0xf]  ;;  %v1573_v34 = vmul.f32 %v1513_v15, %v1518_v17  ;;  %v1590_v39 = vmul.f32 %v1544_v26, %v1525_v20  ;;  %p1292_p7 = pnand %p1291_p6, %p1428_p4  ;;  %p1297_p12 = por %p1296_p11, %p1295_p10 }
  0x39   : > { %2449 = vst [vmem:[#allocation20_spill] sm:$0xff] %v1499_v10  ;;  %v1583_v37 = vld [vmem:[#allocation2 + $0x42] sm:$0xf]  ;;  %v1585_v38 = vld [vmem:[#allocation2 + $0x52] sm:$0xf]  ;;  %v1594_v40 = vmul.f32 %v1547_v27, %v1528_v21  ;;  %v1620_v48 = vmul.f32 %v1599_v42, %v1561_v31  ;;  %v1679_v10 = vmul.f32 %v1510_v14, %v1518_v17 }
  0x3a   : > { %2450 = vst [vmem:[#allocation21_spill] sm:$0xff] %v1502_v11  ;;  %v1596_v41 = vld [vmem:[#allocation2 + $0x62] sm:$0xf]  ;;  %v1624_v49 = vmul.f32 %v1602_v43, %v1583_v37  ;;  %v1636_v52 = vmul.f32 %v1612_v46, %v1585_v38  ;;  %v1675_v11 = vperm.slane %v1472_v1, 4  ;;  %p1293_p9 = pneg %p1292_p7 }
  0x3b   : > { %345 = vst [vmem:[#allocation2 + $0x27] sm:$0x7] %v1367_v0  ;;  %v1640_v53 = vmul.f32 %v1615_v47, %v1596_v41 }
  0x3c   : > { %2451 = vst [vmem:[#allocation22_spill] sm:$0xff] %v1505_v12  ;;  %v1688_v12 = vmul.f32 %v1660_v59, %v1642_v54  ;;  %p1298_p13 = pnand %p1297_p12, %p1293_p9 }
  0x3d   : > { %2452 = vst [vmem:[#allocation23_spill] sm:$0xff] %v1507_v13  ;;  %v1684_v13 = vld [vmem:[#allocation2 + $0x63] sm:$0xf] }
  0x3e   : > { %2453 = vst [vmem:[#allocation24_spill] sm:$0xff] %v1510_v14  ;;  %v1700_v14 = vmul.f32 %v1534_v23, %v1523_v19 }
  0x3f   : > { %2454 = vst [vmem:[#allocation25_spill] sm:$0xff] %v1513_v15 }
  0x40   : > { %346 = vst [vmem:[#allocation2 + $0x37] sm:$0x7] %v1367_v0 }
  0x41   : > { %2455 = vst [vmem:[#allocation26_spill] sm:$0xff] %v1516_v16  ;;  %v1682_v16 = vld [vmem:[#allocation2 + $0x53] sm:$0xf] }
  0x42   : > { %2456 = vst [vmem:[#allocation27_spill] sm:$0xff] %v1518_v17 }
  0x43   : > { %2457 = vst [vmem:[#allocation28_spill] sm:$0xff] %v1520_v18 }
  0x44   : > { %347 = vst [vmem:[#allocation2 + $0x47] sm:$0x7] %v1367_v0 }
  0x45   : > { %2458 = vst [vmem:[#allocation29_spill] sm:$0xff] %v1523_v19 }
  0x46   : > { %2459 = vst [vmem:[#allocation30_spill] sm:$0xff] %v1525_v20 }
  0x47   : > { %348 = vst [vmem:[#allocation2 + $0x57] sm:$0x7] %v1367_v0  ;;  %v1703_v17 = vld [vmem:[#allocation2 + $0x34] sm:$0xf] }
  0x48   : > { %2460 = vst [vmem:[#allocation31_spill] sm:$0xff] %v1528_v21 }
  0x49   : > { %2461 = vst [vmem:[#allocation32_spill] sm:$0xff] %v1531_v22 }
  0x4a   : > { %2462 = vst [vmem:[#allocation33_spill] sm:$0xff] %v1534_v23 }
  0x4b   : > { %349 = vst [vmem:[#allocation2 + $0x67] sm:$0x7] %v1367_v0 }
  0x4c   : > { %2463 = vst [vmem:[#allocation34_spill] sm:$0xff] %v1538_v24 }
  0x4d   : > { %2464 = vst [vmem:[#allocation35_spill] sm:$0xff] %v1541_v25 }
  0x4e   : > { %2465 = vst [vmem:[#allocation36_spill] sm:$0xff] %v1544_v26 }
  0x4f   : > { %2466 = vst [vmem:[#allocation37_spill] sm:$0xff] %v1547_v27 }
  0x50   : > { %350 = vst [vmem:[#allocation2 + $0x77] sm:$0x7] %v1367_v0 }
  0x51   : > { %2467 = vst [vmem:[#allocation38_spill] sm:$0xff] %v1559_v30 }
  0x52   : > { %2468 = vst [vmem:[#allocation39_spill] sm:$0xff] %v1561_v31 }
  0x53   : > { %2469 = vst [vmem:[#allocation40_spill] sm:$0xff] %v1564_v32 }
  0x54   : > { %351 = vst [vmem:[#allocation2 + $0x87] sm:$0x7] %v1367_v0 }
  0x55   : > { %2470 = vst [vmem:[#allocation41_spill] sm:$0xff] %v1583_v37 }
  0x56   : > { %2471 = vst [vmem:[#allocation42_spill] sm:$0xff] %v1585_v38 }
  0x57   : > { %352 = vst [vmem:[#allocation2 + $0x97] sm:$0x7] %v1367_v0 }
  0x58   : > { %2472 = vst [vmem:[#allocation43_spill] sm:$0xff] %v1596_v41 }
  0x59   : > { %2473 = vst [vmem:[#allocation44_spill] sm:$0xff] %v1599_v42 }
  0x5a   : > { %2474 = vst [vmem:[#allocation45_spill] sm:$0xff] %v1602_v43 }
  0x5b   : > { %357 = vst [vmem:[#allocation2] sm:$0xff] %v1367_v0 }
  0x5c   : > { %2475 = vst [vmem:[#allocation46_spill] sm:$0xff] %v1606_v44 }
  0x5d   : > { %2476 = vst [vmem:[#allocation47_spill] sm:$0xff] %v1609_v45 }
  0x5e   : > { %2477 = vst [vmem:[#allocation48_spill] sm:$0xff] %v1612_v46 }
  0x5f   : > { %2478 = vst [vmem:[#allocation49_spill] sm:$0xff] %v1615_v47  ;;  %v1692_v47 = vmul.f32 %v1663_v60, %v1666_v61 }
  0x60   : > { %358 = vst [vmem:[#allocation2 + $0x8] sm:$0x3] %v1367_v0 }
  0x61   : > { %2479 = vst [vmem:[#allocation50_spill] sm:$0xff] %v1627_v50 }
  0x62   : > { %2480 = vst [vmem:[#allocation51_spill] sm:$0xff] %v1631_v51  ;;  %v378_v23 = vld [vmem:[#allocation2] sm:$0xf] }
  0x63   : > { %359 = vst [vmem:[#allocation2 + $0x10] sm:$0xff] %v1367_v0  ;;  %v454_v19 = vld [vmem:[#allocation2 + $0x1] sm:$0xf]  ;;  %v389_v51 = vmul.f32 %v1489_v7, %v378_v23 }
  0x64   : > { %2481 = vst [vmem:[#allocation52_spill] sm:$0xff] %v1642_v54  ;;  %v1734_v54 = vmul.f32 %v1544_v26, %v1528_v21  ;;  %v465_v27 = vmul.f32 %v1531_v22, %v454_v19 }
  0x65   : > { %2482 = vst [vmem:[#allocation53_spill] sm:$0xff] %v1646_v55  ;;  %v1708_v55 = vperm.slane %v1475_v2, 3 }
  0x66   : > { %2483 = vst [vmem:[#allocation54_spill] sm:$0xff] %v1650_v56  ;;  %v1696_v56 = vmul.f32 %v1559_v30, %v1520_v18  ;;  %v1717_v18 = vperm.slane %v1483_v5, 0 }
  0x67   : > { %360 = vst [vmem:[#allocation2 + $0x18] sm:$0x3] %v1367_v0 }
  0x68   : > { %2484 = vst [vmem:[#allocation55_spill] sm:$0xff] %v1654_v57 }
  0x69   : > { %2485 = vst [vmem:[#allocation56_spill] sm:$0xff] %v1657_v58 }
  0x6a   : > { %2486 = vst [vmem:[#allocation57_spill] sm:$0xff] %v1660_v59  ;;  %v1714_v59 = vperm.slane %v1479_v4, 1  ;;  %v379_v26 = vld [vmem:[#allocation2 + $0x10] sm:$0xf] }
  0x6b   : > { %2487 = vst [vmem:[#allocation58_spill] sm:$0xff] %v1663_v60  ;;  %v1711_v60 = vperm.slane %v1477_v3, 2  ;;  %v455_v21 = vld [vmem:[#allocation2 + $0x11] sm:$0xf] }
  0x6c   : > { %361 = vst [vmem:[#allocation2 + $0x20] sm:$0xff] %v1367_v0  ;;  %v707_v19 = vmul.f32 %v1714_v59, %v1703_v17 }
  0x6d   : > { %2488 = vst [vmem:[#allocation59_spill] sm:$0xff] %v1666_v61  ;;  %v1726_v61 = vmul.f32 %v1672_v63, %v1684_v13 }
  0x6e   : > { %2489 = vst [vmem:[#allocation60_spill] sm:$0xff] %v1669_v62 }
  0x6f   : > { %2490 = vst [vmem:[#allocation61_spill] sm:$0xff] %v1672_v63  ;;  %v1741_v63 = vmul.f32 %v1609_v45, %v1561_v31  ;;  %v528_v31 = vld [vmem:[#allocation2 + $0x12] sm:$0xf] }
  0x70   : > { %2491 = vst [vmem:[#allocation62_spill] sm:$0xff] %v1675_v11 }
  0x71   : > { %2492 = vst [vmem:[#allocation63_spill] sm:$0xff] %v1679_v10  ;;  %v1705_v10 = vld [vmem:[#allocation2 + $0x44] sm:$0xf] }
  0x72   : > { %362 = vst [vmem:[#allocation2 + $0x28] sm:$0x3] %v1367_v0 }
  0x73   : > { %2493 = vst [vmem:[#allocation64_spill] sm:$0xff] %v1682_v16 }
  0x74   : > { %2494 = vst [vmem:[#allocation65_spill] sm:$0xff] %v1684_v13  ;;  %v1781_v13 = vmul.f32 %v1612_v46, %v1596_v41  ;;  %v1797_v46 = vld [vmem:[#allocation2 + $0x24] sm:$0xf] }
  0x75   : > { %2495 = vst [vmem:[#allocation66_spill] sm:$0xff] %v1696_v56  ;;  %v1730_v56 = vmul.f32 %v1541_v25, %v1525_v20  ;;  %v1745_v25 = vmul.f32 %v1599_v42, %v1583_v37  ;;  %v394_v42 = vmul.f32 %v1493_v8, %v379_v26  ;;  %v470_v37 = vmul.f32 %v1538_v24, %v455_v21 }
  0x76   : > { %2496 = vst [vmem:[#allocation67_spill] sm:$0xff] %v1700_v14  ;;  %v1722_v14 = vmul.f32 %v1669_v62, %v1682_v16  ;;  %v527_v62 = vld [vmem:[#allocation2 + $0x2] sm:$0xf] }
  0x77   : > { %1127 = vst [vmem:[#allocation2 + $0x70] sm:$0xff] %v1367_v0  ;;  %v600_v16 = vld [vmem:[#allocation2 + $0x3] sm:$0xf]  ;;  %v538_v20 = vmul.f32 %v1564_v32, %v527_v62  ;;  %v1762_v62 = vperm.slane %v1483_v5, 7 }
  0x78   : > { %2497 = vst [vmem:[#allocation68_spill] sm:$0xff] %v1703_v17  ;;  %v611_v23 = vmul.f32 %v1627_v50, %v600_v16  ;;  %v1766_v16 = vmul.f32 %v1602_v43, %v1585_v38  ;;  %v398_v43 = vadd.f32 %v394_v42, %v389_v51  ;;  %v474_v38 = vadd.f32 %v470_v37, %v465_v27  ;;  %v1789_v50 = vld [vmem:[#allocation2 + $0x23] sm:$0xf]  ;;  %v1795_v51 = vld [vmem:[#allocation2 + $0x14] sm:$0xf] }
  0x79   : > { %2498 = vst [vmem:[#allocation69_spill] sm:$0xff] %v1705_v10  ;;  %v625_v42 = vmul.f32 %v1657_v58, %v1789_v50 }
  0x7a   : > { %2499 = vst [vmem:[#allocation70_spill] sm:$0xff] %v1708_v55 }
  0x7b   : > { %2500 = vst [vmem:[#allocation71_spill] sm:$0xff] %v1711_v60 }
  0x7c   : > { %2501 = vst [vmem:[#allocation72_spill] sm:$0xff] %v1714_v59  ;;  %v1771_v59 = vld [vmem:[#allocation2 + $0x21] sm:$0xf] }
  0x7d   : > { %2502 = vst [vmem:[#allocation73_spill] sm:$0xff] %v1717_v18 }
  0x7e   : > { %1128 = vst [vmem:[#allocation2 + $0x78] sm:$0x3] %v1367_v0 }
  0x7f   : > { %2503 = vst [vmem:[#allocation74_spill] sm:$0xff] %v1730_v56  ;;  %v1759_v56 = vld [vmem:[#allocation2 + $0x13] sm:$0xf] }
  0x80   : > { %2504 = vst [vmem:[#allocation75_spill] sm:$0xff] %v1734_v54  ;;  %v1754_v54 = vmul.f32 %v1717_v18, %v1705_v10  ;;  %v1769_v18 = vld [vmem:[#allocation2 + $0x20] sm:$0xf]  ;;  %v543_v10 = vmul.f32 %v1606_v44, %v528_v31  ;;  %v616_v17 = vmul.f32 %v1654_v57, %v1759_v56  ;;  %v673_v57 = vld [vmem:[#allocation2 + $0x4] sm:$0xf] }
  0x81   : > { %1129 = vst [vmem:[#allocation2 + $0x80] sm:$0xff] %v1367_v0  ;;  %v684_v41 = vmul.f32 %v1675_v11, %v673_v57  ;;  %v1812_v57 = vld [vmem:[#allocation2 + $0x15] sm:$0xf] }
  0x82   : > { %2505 = vst [vmem:[#allocation76_spill] sm:$0xff] %v1741_v63  ;;  %v1787_v63 = vld [vmem:[#allocation2 + $0x22] sm:$0xf] }
  0x83   : > { %2506 = vst [vmem:[#allocation77_spill] sm:$0xff] %v1745_v25  ;;  %v1777_v25 = vmul.f32 %v1489_v7, %v379_v26  ;;  %v552_v26 = vmul.f32 %v1609_v45, %v1787_v63  ;;  %v620_v7 = vadd.f32 %v616_v17, %v611_v23  ;;  %v1806_v17 = vmul.f32 %v1564_v32, %v528_v31 }
  0x84   : > { %1130 = vst [vmem:[#allocation2 + $0x88] sm:$0x3] %v1367_v0  ;;  %v1819_v31 = vperm.slane %v1472_v1, 5 }
  0x85   : > { %1131 = vst [vmem:[#allocation2 + $0x90] sm:$0xff] %v1367_v0 }
  0x86   : > { %2507 = vst [vmem:[#allocation78_spill] sm:$0xff] %v1759_v56  ;;  %v547_v56 = vadd.f32 %v543_v10, %v538_v20  ;;  %v629_v10 = vadd.f32 %v625_v42, %v620_v7  ;;  %v1803_v20 = vmul.f32 %v1531_v22, %v455_v21  ;;  %v1816_v21 = vld [vmem:[#allocation2 + $0x54] sm:$0xf] }
  0x87   : > { %2508 = vst [vmem:[#allocation79_spill] sm:$0xff] %v1762_v62 }
  0x88   : > { %2509 = vst [vmem:[#allocation80_spill] sm:$0xff] %v1766_v16  ;;  %v479_v16 = vmul.f32 %v1559_v30, %v1771_v59  ;;  %v689_v30 = vmul.f32 %v1708_v55, %v1795_v51  ;;  %v638_v7 = vadd.f32 %v1688_v12, %v629_v10 }
  0x89   : > { %1132 = vst [vmem:[#allocation2 + $0x98] sm:$0x3] %v1367_v0  ;;  %v403_v0 = vmul.f32 %v1496_v9, %v1769_v18  ;;  %v556_v9 = vadd.f32 %v552_v26, %v547_v56 }
  0x8a   : > { %2510 = vst [vmem:[#allocation81_spill] sm:$0xff] %v1769_v18  ;;  %v483_v37 = vadd.f32 %v479_v16, %v474_v38  ;;  %v698_v38 = vmul.f32 %v1711_v60, %v1797_v46  ;;  %v725_v16 = vmul.f32 %v1762_v62, %v1816_v21  ;;  %v647_v12 = vadd.f32 %v1692_v47, %v638_v7 }
  0x8b   : > { %2511 = vst [vmem:[#allocation82_spill] sm:$0xff] %v1771_v59  ;;  %v407_v27 = vadd.f32 %v403_v0, %v398_v43  ;;  %v746_v43 = vld [vmem:[#allocation2 + $0x5] sm:$0xf]  ;;  %v565_v56 = vadd.f32 %v1620_v48, %v556_v9 }
  0x8c   : > { %2512 = vst [vmem:[#allocation83_spill] sm:$0xff] %v1781_v13  ;;  %v492_v45 = vadd.f32 %v1577_v35, %v483_v37  ;;  %v693_v13 = vadd.f32 %v689_v30, %v684_v41  ;;  %v1830_v48 = vld [vmem:[#allocation2 + $0x25] sm:$0xf]  ;;  %v757_v0 = vmul.f32 %v1819_v31, %v746_v43  ;;  %v1850_v37 = vperm.slane %v1479_v4, 2 }
  0x8d   : > { %2513 = vst [vmem:[#allocation84_spill] sm:$0xff] %v1787_v63  ;;  %v416_v23 = vadd.f32 %v1552_v28, %v407_v27  ;;  %v1822_v28 = vperm.slane %v1475_v2, 4  ;;  %v574_v9 = vadd.f32 %v1624_v49, %v565_v56  ;;  %v1847_v49 = vperm.slane %v1485_v6, 6  ;;  %v1864_v56 = vld [vmem:[#allocation2 + $0x45] sm:$0xf] }
  0x8e   : > { %2514 = vst [vmem:[#allocation85_spill] sm:$0xff] %v1789_v50  ;;  %v501_v35 = vadd.f32 %v1581_v36, %v492_v45  ;;  %v702_v41 = vadd.f32 %v698_v38, %v693_v13  ;;  %v1839_v13 = vld [vmem:[%s2287_s2] ss:$0 sm:$0xff]  ;;  %v1843_v45 = vperm.slane %v1477_v3, 3  ;;  %v656_v10 = vadd.f32 %v1722_v14, %v647_v12  ;;  %v1878_v12 = vld [vmem:[#allocation2 + $0x55] sm:$0xf] }
  0x8f   : > { %2515 = vst [vmem:[#allocation86_spill] sm:$0xff] %v1797_v46  ;;  %v425_v30 = vadd.f32 %v1556_v29, %v416_v23  ;;  %v762_v26 = vmul.f32 %v1822_v28, %v1812_v57  ;;  %v583_v47 = vadd.f32 %v1636_v52, %v574_v9  ;;  %v1854_v23 = vld [vmem:[#allocation2 + $0x64] sm:$0xf]  ;;  %v1869_v14 = vperm.slane %v1483_v5, 1 }
  0x90   : > { %2516 = vst [vmem:[#allocation87_spill] sm:$0xff] %v1822_v28  ;;  %v510_v29 = vadd.f32 %v1590_v39, %v501_v35  ;;  %v711_v36 = vadd.f32 %v707_v19, %v702_v41  ;;  %v1857_v19 = vld [vmem:[#allocation2 + $0x35] sm:$0xf]  ;;  %v771_v52 = vmul.f32 %v1843_v45, %v1830_v48  ;;  %v734_v43 = vmul.f32 %v1847_v49, %v1854_v23 }
  0x91   : > { %v434_v42 = vadd.f32 %v1569_v33, %v425_v30  ;;  %2517 = vst [vmem:[#allocation88_spill] sm:$0xff] %v1843_v45  ;;  %v766_v27 = vadd.f32 %v762_v26, %v757_v0  ;;  %v592_v7 = vadd.f32 %v1640_v53, %v583_v47  ;;  %v1874_v35 = vperm.slane %v1485_v6, 0  ;;  %v1876_v41 = vld [vmem:[#allocation2 + $0x16] sm:$0xf] }
  0x92   : > { %2518 = vst [vmem:[#allocation89_spill] sm:$0xff] %v1847_v49  ;;  %v720_v39 = vadd.f32 %v1754_v54, %v711_v36  ;;  %v519_v38 = vadd.f32 %v1594_v40, %v510_v29  ;;  %v819_v40 = vld [vmem:[#allocation2 + $0x6] sm:$0xf]  ;;  %v789_v0 = vmul.f32 %v1869_v14, %v1864_v56  ;;  %v1883_v26 = vperm.slane %v1472_v1, 6 }
  0x93   : > { %2519 = vst [vmem:[#allocation90_spill] sm:$0xff] %v1850_v37  ;;  %v443_v33 = vadd.f32 %v1573_v34, %v434_v42  ;;  %v780_v34 = vmul.f32 %v1850_v37, %v1857_v19  ;;  %v775_v30 = vadd.f32 %v771_v52, %v766_v27  ;;  %v1886_v42 = vperm.slane %v1475_v2, 5  ;;  %v1891_v27 = vld [vmem:[#allocation2 + $0x26] sm:$0xf] }
  0x94   : > { %2520 = vst [vmem:[#allocation91_spill] sm:$0xff] %v1869_v14  ;;  %v729_v9 = vadd.f32 %v725_v16, %v720_v39  ;;  %v665_v29 = vadd.f32 %v1726_v61, %v656_v10  ;;  %v798_v47 = vmul.f32 %v1874_v35, %v1878_v12  ;;  %v1894_v16 = vperm.slane %v1485_v6, 7  ;;  %v1902_v52 = vld [vmem:[#allocation2 + $0x65] sm:$0xf] }
  0x95   : > { %v450_v54 = vadd.f32 %v1839_v13, %v443_v33  ;;  %2521 = vst [vmem:[#allocation92_spill] sm:$0xff] %v1874_v35  ;;  %v784_v36 = vadd.f32 %v780_v34, %v775_v30  ;;  %v830_v33 = vmul.f32 %v1883_v26, %v819_v40  ;;  %v835_v1 = vmul.f32 %v1886_v42, %v1876_v41  ;;  %v1912_v30 = vld [vmem:[#allocation2 + $0x36] sm:$0xf] }
  0x96   : > { %2522 = vst [vmem:[#allocation93_spill] sm:$0xff] %v1878_v12  ;;  %v1900_v2 = vperm.slane %v1477_v3, 4  ;;  %v1905_v10 = vperm.slane %v1479_v4, 3  ;;  %v738_v34 = vadd.f32 %v734_v43, %v729_v9  ;;  %v1927_v9 = vperm.slane %v1485_v6, 1 }
  0x97   : > { %2523 = vst [vmem:[#allocation94_spill] sm:$0xff] %v1883_v26  ;;  %v523_v53 = vadd.f32 %v519_v38, %v450_v54  ;;  %v793_v61 = vadd.f32 %v789_v0, %v784_v36  ;;  %v1908_v38 = vperm.slane %v1483_v5, 2  ;;  %v807_v54 = vmul.f32 %v1894_v16, %v1902_v52  ;;  %v1920_v36 = vld [vmem:[#allocation2 + $0x46] sm:$0xf] }
  0x98   : > { %2524 = vst [vmem:[#allocation95_spill] sm:$0xff] %v1886_v42  ;;  %v839_v40 = vadd.f32 %v835_v1, %v830_v33  ;;  %v844_v3 = vmul.f32 %v1900_v2, %v1891_v27  ;;  %v1922_v5 = vld [vmem:[#allocation2 + $0x66] sm:$0xf]  ;;  %v853_v43 = vmul.f32 %v1905_v10, %v1912_v30  ;;  %v1929_v33 = vld [vmem:[#allocation2 + $0x56] sm:$0xf] }
  0x99   : > { %2525 = vst [vmem:[#allocation96_spill] sm:$0xff] %v1894_v16  ;;  %v596_v39 = vadd.f32 %v592_v7, %v523_v53  ;;  %v1916_v7 = vld [vmem:[#allocation4 + $0x30] ss:$0 sm:$0xff]  ;;  %v802_v4 = vadd.f32 %v798_v47, %v793_v61  ;;  %v862_v32 = vmul.f32 %v1908_v38, %v1920_v36  ;;  %v395_v47 = vmul.f32 %v1493_v8, %v1769_v18  ;;  %v2539_v8 = vld [vmem:[#allocation78_spill] sm:$0xff] }
  0x9a   : > { %2526 = vst [vmem:[#allocation97_spill] sm:$0xff] %v1900_v2  ;;  %v1918_v53 = vld [vmem:[#allocation2 + $0x70] sm:$0xf]  ;;  %v848_v1 = vadd.f32 %v844_v3, %v839_v40  ;;  %v871_v22 = vmul.f32 %v1927_v9, %v1929_v33  ;;  %v471_v40 = vmul.f32 %v1538_v24, %v1771_v59  ;;  %v2542_v24 = vld [vmem:[#allocation51_spill] sm:$0xff] }
  0x9b   : > { %2527 = vst [vmem:[#allocation98_spill] sm:$0xff] %v1902_v52  ;;  %v669_v0 = vadd.f32 %v665_v29, %v596_v39  ;;  %v880_v29 = vmul.f32 %v1916_v7, %v1922_v5  ;;  %v1937_v39 = vld [vmem:[#allocation2 + $0x71] sm:$0xf]  ;;  %v440_v6 = vmul.f32 %v1513_v15, %v1918_v53  ;;  %v811_v3 = vadd.f32 %v807_v54, %v802_v4  ;;  %v2541_v15 = vld [vmem:[#allocation55_spill] sm:$0xff] }
  0x9c   : > { %2528 = vst [vmem:[#allocation99_spill] sm:$0xff] %v1905_v10  ;;  %v399_v10 = vadd.f32 %v395_v47, %v1777_v25  ;;  %v2543_v25 = vld [vmem:[#allocation52_spill] sm:$0xff]  ;;  %v2544_v47 = vld [vmem:[#allocation66_spill] sm:$0xff] }
  0x9d   : > { %2529 = vst [vmem:[#allocation100_spill] sm:$0xff] %v1908_v38  ;;  %v742_v61 = vadd.f32 %v738_v34, %v669_v0  ;;  %v857_v38 = vadd.f32 %v853_v43, %v848_v1  ;;  %v2538_v34 = vld [vmem:[#allocation37_spill] sm:$0xff]  ;;  %v626_v43 = vmul.f32 %v1657_v58, %v2543_v25  ;;  %v2548_v59 = vld [vmem:[#allocation76_spill] sm:$0xff] }
  0x9e   : > { %2530 = vst [vmem:[#allocation101_spill] sm:$0xff] %v1912_v30  ;;  %v516_v0 = vmul.f32 %v2538_v34, %v1937_v39  ;;  %v408_v54 = vadd.f32 %v2542_v24, %v399_v10  ;;  %v2546_v34 = vld [vmem:[#allocation57_spill] sm:$0xff]  ;;  %v2551_v10 = vld [vmem:[#allocation67_spill] sm:$0xff]  ;;  %v2553_v58 = vld [vmem:[#allocation60_spill] sm:$0xff] }
  0x9f   : > { %2531 = vst [vmem:[#allocation102_spill] sm:$0xff] %v1916_v7  ;;  %v544_v7 = vmul.f32 %v1606_v44, %v1787_v63  ;;  %v815_v1 = vadd.f32 %v811_v3, %v742_v61  ;;  %v2545_v44 = vld [vmem:[#allocation59_spill] sm:$0xff] }
  0xa0   : > { %2532 = vst [vmem:[#allocation103_spill] sm:$0xff] %v1918_v53  ;;  %v617_v53 = vmul.f32 %v2541_v15, %v1789_v50  ;;  %v2552_v50 = vld [vmem:[#allocation65_spill] sm:$0xff] }
  0xa1   : > { %2533 = vst [vmem:[#allocation104_spill] sm:$0xff] %v1920_v36  ;;  %v548_v4 = vadd.f32 %v544_v7, %v1806_v17  ;;  %v653_v61 = vmul.f32 %v2553_v58, %v2552_v50  ;;  %v2561_v58 = vld [vmem:[#allocation80_spill] sm:$0xff]  ;;  %v2563_v50 = vld [vmem:[#allocation49_spill] sm:$0xff] }
  0xa2   : > { %2534 = vst [vmem:[#allocation105_spill] sm:$0xff] %v1922_v5  ;;  %v475_v5 = vadd.f32 %v471_v40, %v1803_v20 }
  0xa3   : > { %2535 = vst [vmem:[#allocation106_spill] sm:$0xff] %v1927_v9  ;;  %v2540_v9 = vld [vmem:[#allocation50_spill] sm:$0xff]  ;;  %v557_v15 = vadd.f32 %v2548_v59, %v548_v4  ;;  %v690_v4 = vmul.f32 %v1708_v55, %v1797_v46 }
  0xa4   : > { %2536 = vst [vmem:[#allocation107_spill] sm:$0xff] %v1929_v33  ;;  %v612_v18 = vmul.f32 %v2540_v9, %v2539_v8  ;;  %v866_v33 = vadd.f32 %v862_v32, %v857_v38  ;;  %v484_v20 = vadd.f32 %v2544_v47, %v475_v5  ;;  %v2547_v8 = vld [vmem:[#allocation53_spill] sm:$0xff]  ;;  %v2549_v32 = vld [vmem:[#allocation64_spill] sm:$0xff]  ;;  %v2550_v38 = vld [vmem:[#allocation58_spill] sm:$0xff] }
  0xa5   : > { %2537 = vst [vmem:[#allocation108_spill] sm:$0xff] %v1937_v39  ;;  %v635_v39 = vmul.f32 %v2546_v34, %v2545_v44  ;;  %v417_v9 = vadd.f32 %v2547_v8, %v408_v54  ;;  %v644_v24 = vmul.f32 %v2550_v38, %v2549_v32  ;;  %v2554_v5 = vld [vmem:[#allocation54_spill] sm:$0xff]  ;;  %v1975_v54 = vld [vmem:[#allocation2 + $0x73] sm:$0xf] }
  0xa6   : > { %v621_v40 = vadd.f32 %v617_v53, %v612_v18  ;;  %v875_v63 = vadd.f32 %v871_v22, %v866_v33  ;;  %v493_v17 = vadd.f32 %v2551_v10, %v484_v20  ;;  %v685_v18 = vmul.f32 %v1675_v11, %v1795_v51  ;;  %v1972_v22 = vld [vmem:[#allocation2 + $0x72] sm:$0xf]  ;;  %v2555_v33 = vld [vmem:[#allocation77_spill] sm:$0xff]  ;;  %v2560_v10 = vld [vmem:[#allocation63_spill] sm:$0xff] }
  0xa7   : > { %v426_v3 = vadd.f32 %v2554_v5, %v417_v9  ;;  %v566_v59 = vadd.f32 %v2555_v33, %v557_v15  ;;  %v2558_v51 = vld [vmem:[#allocation69_spill] sm:$0xff]  ;;  %v2562_v33 = vld [vmem:[#allocation75_spill] sm:$0xff]  ;;  %v589_v55 = vmul.f32 %v2563_v50, %v1972_v22 }
  0xa8   : > { %v630_v7 = vadd.f32 %v626_v43, %v621_v40  ;;  %v884_v53 = vadd.f32 %v880_v29, %v875_v63  ;;  %v2556_v43 = vld [vmem:[#allocation74_spill] sm:$0xff]  ;;  %v2557_v40 = vld [vmem:[#allocation68_spill] sm:$0xff]  ;;  %v694_v15 = vadd.f32 %v690_v4, %v685_v18 }
  0xa9   : > { %v502_v47 = vadd.f32 %v2556_v43, %v493_v17  ;;  %v699_v8 = vmul.f32 %v1711_v60, %v2557_v40  ;;  %v2559_v63 = vld [vmem:[#allocation72_spill] sm:$0xff]  ;;  %v435_v5 = vadd.f32 %v2560_v10, %v426_v3  ;;  %v575_v11 = vadd.f32 %v2561_v58, %v566_v59  ;;  %v2565_v43 = vld [vmem:[#allocation83_spill] sm:$0xff] }
  0xaa   : > { %v639_v20 = vadd.f32 %v635_v39, %v630_v7  ;;  %v708_v29 = vmul.f32 %v2559_v63, %v2558_v51  ;;  %v888_v9 = vadd.f32 %v884_v53, %v815_v1  ;;  %v2564_v39 = vld [vmem:[#allocation61_spill] sm:$0xff]  ;;  %v1993_v63 = vld [vmem:[#allocation2 + $0x74] sm:$0xf]  ;;  %v726_v3 = vmul.f32 %v1762_v62, %v1854_v23 }
  0xab   : > { %v511_v38 = vadd.f32 %v2562_v33, %v502_v47  ;;  %v662_v17 = vmul.f32 %v2564_v39, %v1975_v54  ;;  %v444_v7 = vadd.f32 %v440_v6, %v435_v5  ;;  %v584_v60 = vadd.f32 %v2565_v43, %v575_v11  ;;  %v2566_v53 = vld [vmem:[#allocation73_spill] sm:$0xff] }
  0xac   : > { %v648_v46 = vadd.f32 %v644_v24, %v639_v20  ;;  %892 = vst [vmem:[%s1463_s18] sm:$0xf] %v888_v9  ;;  %v703_v1 = vadd.f32 %v699_v8, %v694_v15  ;;  %v717_v58 = vmul.f32 %v2566_v53, %v1816_v21  ;;  %v758_v24 = vmul.f32 %v1819_v31, %v1812_v57  ;;  %v2024_v43 = vld [vmem:[#allocation2 + $0x76] sm:$0xf] }
  0xad   : > { %v763_v59 = vmul.f32 %v1822_v28, %v1830_v48  ;;  %v451_v6 = vadd.f32 %v1839_v13, %v444_v7  ;;  %v520_v4 = vadd.f32 %v516_v0, %v511_v38  ;;  %v772_v47 = vmul.f32 %v1843_v45, %v1857_v19  ;;  %2568 = vst [vmem:[#allocation51_spill] sm:$0xff] %v2024_v43 }
  0xae   : > { %v657_v18 = vadd.f32 %v653_v61, %v648_v46  ;;  %v712_v11 = vadd.f32 %v708_v29, %v703_v1  ;;  %v593_v20 = vadd.f32 %v589_v55, %v584_v60  ;;  %v735_v46 = vmul.f32 %v1847_v49, %v1993_v63  ;;  %v2008_v61 = vld [vmem:[#allocation2 + $0x75] sm:$0xf] }
  0xaf   : > { %2567 = vst [vmem:[#allocation78_spill] sm:$0xff] %v2008_v61  ;;  %v767_v8 = vadd.f32 %v763_v59, %v758_v24  ;;  %v781_v57 = vmul.f32 %v1850_v37, %v1864_v56  ;;  %v524_v9 = vadd.f32 %v520_v4, %v451_v6  ;;  %v790_v0 = vmul.f32 %v1869_v14, %v1878_v12  ;;  %v2570_v24 = vld [vmem:[#allocation107_spill] sm:$0xff]  ;;  %v2571_v59 = vld [vmem:[#allocation100_spill] sm:$0xff] }
  0xb0   : > { %v666_v10 = vadd.f32 %v662_v17, %v657_v18  ;;  %v721_v5 = vadd.f32 %v717_v58, %v712_v11  ;;  %v831_v29 = vmul.f32 %v1883_v26, %v1876_v41  ;;  %v836_v55 = vmul.f32 %v1886_v42, %v1891_v27  ;;  %v2569_v41 = vld [vmem:[#allocation99_spill] sm:$0xff] }
  0xb1   : > { %v776_v38 = vadd.f32 %v772_v47, %v767_v8  ;;  %v845_v60 = vmul.f32 %v1900_v2, %v1912_v30  ;;  %v597_v15 = vadd.f32 %v593_v20, %v524_v9  ;;  %v799_v7 = vmul.f32 %v1874_v35, %v1902_v52  ;;  %v2572_v47 = vld [vmem:[#allocation81_spill] sm:$0xff]  ;;  %v2574_v8 = vld [vmem:[#allocation22_spill] sm:$0xff] }
  0xb2   : > { %v730_v33 = vadd.f32 %v726_v3, %v721_v5  ;;  %v808_v17 = vmul.f32 %v1894_v16, %v2008_v61  ;;  %v840_v58 = vadd.f32 %v836_v55, %v831_v29  ;;  %v854_v18 = vmul.f32 %v2569_v41, %v1920_v36  ;;  %v2573_v3 = vld [vmem:[#allocation17_spill] sm:$0xff]  ;;  %v2575_v9 = vld [vmem:[#allocation18_spill] sm:$0xff] }
  0xb3   : > { %v785_v1 = vadd.f32 %v781_v57, %v776_v38  ;;  %v863_v6 = vmul.f32 %v2571_v59, %v2570_v24  ;;  %v670_v4 = vadd.f32 %v666_v10, %v597_v15  ;;  %v391_v20 = vmul.f32 %v2573_v3, %v2572_v47  ;;  %v2576_v35 = vld [vmem:[#allocation105_spill] sm:$0xff]  ;;  %v2577_v61 = vld [vmem:[#allocation106_spill] sm:$0xff]  ;;  %v2580_v10 = vld [vmem:[#allocation23_spill] sm:$0xff] }
  0xb4   : > { %v739_v11 = vadd.f32 %v735_v46, %v730_v33  ;;  %v396_v5 = vmul.f32 %v2575_v9, %v2574_v8  ;;  %v849_v16 = vadd.f32 %v845_v60, %v840_v58  ;;  %v872_v57 = vmul.f32 %v2577_v61, %v2576_v35  ;;  %v2578_v38 = vld [vmem:[#allocation102_spill] sm:$0xff]  ;;  %v2581_v46 = vld [vmem:[#allocation19_spill] sm:$0xff]  ;;  %v2583_v47 = vld [vmem:[#allocation20_spill] sm:$0xff] }
  0xb5   : > { %v794_v2 = vadd.f32 %v790_v0, %v785_v1  ;;  %v881_v29 = vmul.f32 %v2578_v38, %v2024_v43  ;;  %v2038_v55 = vld [vmem:[#allocation2 + $0x80] sm:$0xf]  ;;  %v405_v15 = vmul.f32 %v2581_v46, %v2580_v10  ;;  %v2584_v0 = vld [vmem:[#allocation27_spill] sm:$0xff]  ;;  %v2585_v60 = vld [vmem:[#allocation21_spill] sm:$0xff] }
  0xb6   : > { %2579 = vst [vmem:[#allocation52_spill] sm:$0xff] %v2038_v55  ;;  %v743_v41 = vadd.f32 %v739_v11, %v670_v4  ;;  %v400_v59 = vadd.f32 %v396_v5, %v391_v20  ;;  %v2582_v33 = vld [vmem:[#allocation26_spill] sm:$0xff]  ;;  %v858_v9 = vadd.f32 %v854_v18, %v849_v16  ;;  %v423_v1 = vmul.f32 %v2585_v60, %v2584_v0  ;;  %v2587_v61 = vld [vmem:[#allocation32_spill] sm:$0xff]  ;;  %v2588_v38 = vld [vmem:[#allocation103_spill] sm:$0xff] }
  0xb7   : > { %v414_v3 = vmul.f32 %v2583_v47, %v2582_v33  ;;  %v803_v24 = vadd.f32 %v799_v7, %v794_v2  ;;  %v2586_v58 = vld [vmem:[#allocation82_spill] sm:$0xff]  ;;  %v2589_v43 = vld [vmem:[#allocation24_spill] sm:$0xff]  ;;  %v2590_v4 = vld [vmem:[#allocation25_spill] sm:$0xff] }
  0xb8   : > { %v467_v8 = vmul.f32 %v2587_v61, %v2586_v58  ;;  %v409_v35 = vadd.f32 %v405_v15, %v400_v59  ;;  %v432_v36 = vmul.f32 %v2589_v43, %v2588_v38  ;;  %v441_v11 = vmul.f32 %v2590_v4, %v2038_v55  ;;  %v2591_v20 = vld [vmem:[#allocation28_spill] sm:$0xff]  ;;  %v2592_v5 = vld [vmem:[#allocation34_spill] sm:$0xff]  ;;  %v2593_v16 = vld [vmem:[#allocation29_spill] sm:$0xff] }
  0xb9   : > { %v472_v46 = vmul.f32 %v2592_v5, %v2591_v20  ;;  %v812_v10 = vadd.f32 %v808_v17, %v803_v24  ;;  %v867_v47 = vadd.f32 %v863_v6, %v858_v9  ;;  %v2054_v2 = vld [vmem:[#allocation2 + $0x81] sm:$0xf]  ;;  %v2596_v0 = vld [vmem:[#allocation33_spill] sm:$0xff]  ;;  %v2597_v61 = vld [vmem:[#allocation31_spill] sm:$0xff] }
  0xba   : > { %v2594_v7 = vld [vmem:[#allocation38_spill] sm:$0xff]  ;;  %v418_v59 = vadd.f32 %v414_v3, %v409_v35  ;;  %v2598_v43 = vld [vmem:[#allocation35_spill] sm:$0xff]  ;;  %v2599_v33 = vld [vmem:[#allocation84_spill] sm:$0xff] }
  0xbb   : > { %v481_v18 = vmul.f32 %v2594_v7, %v2593_v16  ;;  %v2595_v60 = vld [vmem:[#allocation30_spill] sm:$0xff]  ;;  %v476_v15 = vadd.f32 %v472_v46, %v467_v8  ;;  %v499_v38 = vmul.f32 %v2598_v43, %v2597_v61  ;;  %v2600_v4 = vld [vmem:[#allocation40_spill] sm:$0xff]  ;;  %v816_v42 = vadd.f32 %v812_v10, %v743_v41  ;;  %v2603_v9 = vld [vmem:[#allocation39_spill] sm:$0xff] }
  0xbc   : > { %v490_v58 = vmul.f32 %v2596_v0, %v2595_v60  ;;  %v540_v55 = vmul.f32 %v2600_v4, %v2599_v33  ;;  %v876_v5 = vadd.f32 %v872_v57, %v867_v47  ;;  %v2601_v17 = vld [vmem:[#allocation108_spill] sm:$0xff]  ;;  %v2604_v20 = vld [vmem:[#allocation46_spill] sm:$0xff]  ;;  %v427_v7 = vadd.f32 %v423_v1, %v418_v59  ;;  %v2605_v0 = vld [vmem:[#allocation37_spill] sm:$0xff] }
  0xbd   : > { %v2602_v24 = vld [vmem:[#allocation36_spill] sm:$0xff]  ;;  %v545_v30 = vmul.f32 %v2604_v20, %v2603_v9  ;;  %v485_v16 = vadd.f32 %v481_v18, %v476_v15  ;;  %v517_v35 = vmul.f32 %v2605_v0, %v2054_v2  ;;  %v2606_v3 = vld [vmem:[#allocation41_spill] sm:$0xff]  ;;  %v2607_v8 = vld [vmem:[#allocation47_spill] sm:$0xff] }
  0xbe   : > { %v508_v6 = vmul.f32 %v2602_v24, %v2601_v17  ;;  %v554_v46 = vmul.f32 %v2607_v8, %v2606_v3  ;;  %v885_v43 = vadd.f32 %v881_v29, %v876_v5  ;;  %v2608_v60 = vld [vmem:[#allocation42_spill] sm:$0xff]  ;;  %v2609_v33 = vld [vmem:[#allocation44_spill] sm:$0xff]  ;;  %v2610_v57 = vld [vmem:[#allocation43_spill] sm:$0xff]  ;;  %v436_v24 = vadd.f32 %v432_v36, %v427_v7 }
  0xbf   : > { %v549_v61 = vadd.f32 %v545_v30, %v540_v55  ;;  %v563_v41 = vmul.f32 %v2609_v33, %v2608_v60  ;;  %v2611_v10 = vld [vmem:[#allocation45_spill] sm:$0xff]  ;;  %v494_v4 = vadd.f32 %v490_v58, %v485_v16  ;;  %v2076_v20 = vld [vmem:[#allocation2 + $0x82] sm:$0xf]  ;;  %v2614_v15 = vld [vmem:[#allocation55_spill] sm:$0xff]  ;;  %v636_v7 = vmul.f32 %v2546_v34, %v2549_v32 }
  0xc0   : > { %v572_v47 = vmul.f32 %v2611_v10, %v2610_v57  ;;  %v2612_v1 = vld [vmem:[#allocation85_spill] sm:$0xff]  ;;  %v2613_v18 = vld [vmem:[#allocation50_spill] sm:$0xff]  ;;  %v618_v0 = vmul.f32 %v2614_v15, %v2543_v25  ;;  %v889_v8 = vadd.f32 %v885_v43, %v816_v42  ;;  %v2615_v30 = vld [vmem:[#allocation48_spill] sm:$0xff]  ;;  %v445_v60 = vadd.f32 %v441_v11, %v436_v24 }
  0xc1   : > { %v613_v59 = vmul.f32 %v2613_v18, %v2612_v1  ;;  %v558_v29 = vadd.f32 %v554_v46, %v549_v61  ;;  %v581_v55 = vmul.f32 %v2615_v30, %v1972_v22  ;;  %v2616_v5 = vld [vmem:[#allocation56_spill] sm:$0xff]  ;;  %v503_v10 = vadd.f32 %v499_v38, %v494_v4  ;;  %v2086_v36 = vld [vmem:[#allocation2 + $0x83] sm:$0xf]  ;;  %v2617_v61 = vld [vmem:[#allocation65_spill] sm:$0xff] }
  0xc2   : > { %v627_v33 = vmul.f32 %v2616_v5, %v2545_v44  ;;  %893 = vst [vmem:[%s1463_s18 + $0x4] sm:$0xf] %v889_v8  ;;  %v590_v42 = vmul.f32 %v2563_v50, %v2076_v20  ;;  %v2618_v43 = vld [vmem:[#allocation58_spill] sm:$0xff]  ;;  %v452_v11 = vadd.f32 %v1839_v13, %v445_v60  ;;  %v2622_v8 = vld [vmem:[#allocation60_spill] sm:$0xff]  ;;  %v2623_v34 = vld [vmem:[#allocation71_spill] sm:$0xff] }
  0xc3   : > { %v622_v16 = vadd.f32 %v618_v0, %v613_v59  ;;  %v567_v58 = vadd.f32 %v563_v41, %v558_v29  ;;  %v645_v46 = vmul.f32 %v2618_v43, %v2617_v61  ;;  %v2619_v1 = vld [vmem:[#allocation86_spill] sm:$0xff]  ;;  %v512_v38 = vadd.f32 %v508_v6, %v503_v10  ;;  %v2624_v60 = vld [vmem:[#allocation72_spill] sm:$0xff] }
  0xc4   : > { %v2620_v30 = vld [vmem:[#allocation62_spill] sm:$0xff]  ;;  %v654_v41 = vmul.f32 %v2622_v8, %v1975_v54  ;;  %v663_v29 = vmul.f32 %v2564_v39, %v2086_v36  ;;  %v700_v43 = vmul.f32 %v2623_v34, %v2558_v51  ;;  %v709_v6 = vmul.f32 %v2624_v60, %v1816_v21 }
  0xc5   : > { %v686_v15 = vmul.f32 %v2620_v30, %v2619_v1  ;;  %v631_v4 = vadd.f32 %v627_v33, %v622_v16  ;;  %v2621_v0 = vld [vmem:[#allocation70_spill] sm:$0xff]  ;;  %v576_v59 = vadd.f32 %v572_v47, %v567_v58  ;;  %v521_v61 = vadd.f32 %v517_v35, %v512_v38 }
  0xc6   : > { %v691_v24 = vmul.f32 %v2621_v0, %v2557_v40  ;;  %v2108_v10 = vld [vmem:[#allocation2 + $0x84] sm:$0xf]  ;;  %v718_v47 = vmul.f32 %v2566_v53, %v1854_v23  ;;  %v759_v16 = vmul.f32 %v1819_v31, %v1830_v48  ;;  %v764_v58 = vmul.f32 %v1822_v28, %v1857_v19 }
  0xc7   : > { %v640_v50 = vadd.f32 %v636_v7, %v631_v4  ;;  %v585_v33 = vadd.f32 %v581_v55, %v576_v59  ;;  %v525_v39 = vadd.f32 %v521_v61, %v452_v11  ;;  %v727_v55 = vmul.f32 %v1762_v62, %v1993_v63  ;;  %v2124_v28 = vld [vmem:[#allocation2 + $0x85] sm:$0xf] }
  0xc8   : > { %v695_v1 = vadd.f32 %v691_v24, %v686_v15  ;;  %v773_v15 = vmul.f32 %v1843_v45, %v1864_v56  ;;  %v768_v38 = vadd.f32 %v764_v58, %v759_v16  ;;  %v782_v4 = vmul.f32 %v1850_v37, %v1878_v12  ;;  %2625 = vst [vmem:[#allocation66_spill] sm:$0xff] %v2124_v28  ;;  %v2627_v11 = vld [vmem:[#allocation95_spill] sm:$0xff]  ;;  %v2630_v58 = vld [vmem:[#allocation104_spill] sm:$0xff] }
  0xc9   : > { %v649_v34 = vadd.f32 %v645_v46, %v640_v50  ;;  %v594_v7 = vadd.f32 %v590_v42, %v585_v33  ;;  %v736_v48 = vmul.f32 %v1847_v49, %v2108_v10  ;;  %v791_v50 = vmul.f32 %v1869_v14, %v1902_v52  ;;  %v2626_v46 = vld [vmem:[#allocation101_spill] sm:$0xff]  ;;  %v2632_v12 = vld [vmem:[#allocation96_spill] sm:$0xff]  ;;  %v2645_v49 = vld [vmem:[#allocation106_spill] sm:$0xff] }
  0xca   : > { %v704_v35 = vadd.f32 %v700_v43, %v695_v1  ;;  %v777_v43 = vadd.f32 %v773_v15, %v768_v38  ;;  %v832_v42 = vmul.f32 %v1883_v26, %v1891_v27  ;;  %v837_v1 = vmul.f32 %v2627_v11, %v2626_v46  ;;  %v2635_v27 = vld [vmem:[#allocation99_spill] sm:$0xff] }
  0xcb   : > { %v658_v24 = vadd.f32 %v654_v41, %v649_v34  ;;  %v598_v61 = vadd.f32 %v594_v7, %v525_v39  ;;  %v2628_v34 = vld [vmem:[#allocation78_spill] sm:$0xff]  ;;  %v2629_v41 = vld [vmem:[#allocation92_spill] sm:$0xff]  ;;  %v809_v14 = vmul.f32 %v2632_v12, %v2124_v28  ;;  %v2634_v7 = vld [vmem:[#allocation107_spill] sm:$0xff] }
  0xcc   : > { %v713_v59 = vadd.f32 %v709_v6, %v704_v35  ;;  %v800_v6 = vmul.f32 %v2629_v41, %v2628_v34  ;;  %v2631_v35 = vld [vmem:[#allocation97_spill] sm:$0xff]  ;;  %v786_v45 = vadd.f32 %v782_v4, %v777_v43  ;;  %v2138_v39 = vld [vmem:[#allocation2 + $0x86] sm:$0xf]  ;;  %v841_v15 = vadd.f32 %v837_v1, %v832_v42 }
  0xcd   : > { %v667_v33 = vadd.f32 %v663_v29, %v658_v24  ;;  %v846_v37 = vmul.f32 %v2631_v35, %v2630_v58  ;;  %2633 = vst [vmem:[#allocation59_spill] sm:$0xff] %v2138_v39  ;;  %v855_v38 = vmul.f32 %v2635_v27, %v2634_v7  ;;  %v2636_v29 = vld [vmem:[#allocation105_spill] sm:$0xff]  ;;  %v2640_v4 = vld [vmem:[#allocation23_spill] sm:$0xff]  ;;  %v2641_v43 = vld [vmem:[#allocation18_spill] sm:$0xff] }
  0xce   : > { %v722_v16 = vadd.f32 %v718_v47, %v713_v59  ;;  %v2637_v47 = vld [vmem:[#allocation100_spill] sm:$0xff]  ;;  %v2638_v59 = vld [vmem:[#allocation22_spill] sm:$0xff]  ;;  %v2639_v41 = vld [vmem:[#allocation17_spill] sm:$0xff]  ;;  %v795_v34 = vadd.f32 %v791_v50, %v786_v45  ;;  %v397_v58 = vmul.f32 %v2641_v43, %v2640_v4 }
  0xcf   : > { %v671_v26 = vadd.f32 %v667_v33, %v598_v61  ;;  %v864_v24 = vmul.f32 %v2637_v47, %v2636_v29  ;;  %v392_v46 = vmul.f32 %v2639_v41, %v2638_v59  ;;  %v850_v35 = vadd.f32 %v846_v37, %v841_v15  ;;  %v2642_v12 = vld [vmem:[#allocation26_spill] sm:$0xff]  ;;  %v2643_v28 = vld [vmem:[#allocation19_spill] sm:$0xff]  ;;  %v387_v45 = vld [vmem:[#allocation2 + $0x90] sm:$0xf] }
  0xd0   : > { %v731_v11 = vadd.f32 %v727_v55, %v722_v16  ;;  %v406_v52 = vmul.f32 %v2643_v28, %v2642_v12  ;;  %v2644_v1 = vld [vmem:[#allocation51_spill] sm:$0xff]  ;;  %v2646_v55 = vld [vmem:[#allocation102_spill] sm:$0xff]  ;;  %v2648_v16 = vld [vmem:[#allocation20_spill] sm:$0xff]  ;;  %v804_v29 = vadd.f32 %v800_v6, %v795_v34 }
  0xd1   : > { %v873_v27 = vmul.f32 %v2645_v49, %v2644_v1  ;;  %v882_v61 = vmul.f32 %v2646_v55, %v2138_v39  ;;  %v2647_v33 = vld [vmem:[#allocation27_spill] sm:$0xff]  ;;  %v859_v41 = vadd.f32 %v855_v38, %v850_v35  ;;  %v401_v37 = vadd.f32 %v397_v58, %v392_v46  ;;  %v2650_v15 = vld [vmem:[#allocation21_spill] sm:$0xff]  ;;  %v2651_v43 = vld [vmem:[#allocation28_spill] sm:$0xff] }
  0xd2   : > { %v740_v42 = vadd.f32 %v736_v48, %v731_v11  ;;  %v415_v47 = vmul.f32 %v2648_v16, %v2647_v33  ;;  %v2649_v50 = vld [vmem:[#allocation103_spill] sm:$0xff]  ;;  %v2652_v28 = vld [vmem:[#allocation32_spill] sm:$0xff]  ;;  %v2653_v48 = vld [vmem:[#allocation29_spill] sm:$0xff]  ;;  %v813_v39 = vadd.f32 %v809_v14, %v804_v29 }
  0xd3   : > { %v424_v59 = vmul.f32 %v2650_v15, %v2649_v50  ;;  %v468_v12 = vmul.f32 %v2652_v28, %v2651_v43  ;;  %v2654_v11 = vld [vmem:[#allocation34_spill] sm:$0xff]  ;;  %v868_v62 = vadd.f32 %v864_v24, %v859_v41  ;;  %v410_v33 = vadd.f32 %v406_v52, %v401_v37  ;;  %v2657_v34 = vld [vmem:[#allocation52_spill] sm:$0xff]  ;;  %v2659_v46 = vld [vmem:[#allocation25_spill] sm:$0xff] }
  0xd4   : > { %v744_v4 = vadd.f32 %v740_v42, %v671_v26  ;;  %v473_v49 = vmul.f32 %v2654_v11, %v2653_v48  ;;  %v2655_v1 = vld [vmem:[#allocation30_spill] sm:$0xff]  ;;  %v2658_v6 = vld [vmem:[#allocation24_spill] sm:$0xff]  ;;  %v442_v58 = vmul.f32 %v2659_v46, %v387_v45  ;;  %v2660_v26 = vld [vmem:[#allocation31_spill] sm:$0xff]  ;;  %v628_v46 = vmul.f32 %v2616_v5, %v2549_v32 }
  0xd5   : > { %v2656_v7 = vld [vmem:[#allocation38_spill] sm:$0xff]  ;;  %v433_v35 = vmul.f32 %v2658_v6, %v2657_v34  ;;  %v463_v38 = vld [vmem:[#allocation2 + $0x91] sm:$0xf]  ;;  %v2661_v42 = vld [vmem:[#allocation33_spill] sm:$0xff]  ;;  %v877_v48 = vadd.f32 %v873_v27, %v868_v62  ;;  %v419_v11 = vadd.f32 %v415_v47, %v410_v33  ;;  %v687_v32 = vmul.f32 %v2620_v30, %v2557_v40 }
  0xd6   : > { %v482_v55 = vmul.f32 %v2656_v7, %v2655_v1  ;;  %v477_v16 = vadd.f32 %v473_v49, %v468_v12  ;;  %v491_v50 = vmul.f32 %v2661_v42, %v2660_v26  ;;  %v2662_v15 = vld [vmem:[#allocation35_spill] sm:$0xff]  ;;  %v817_v28 = vadd.f32 %v813_v39, %v744_v4  ;;  %v2663_v14 = vld [vmem:[#allocation40_spill] sm:$0xff]  ;;  %v2665_v1 = vld [vmem:[#allocation46_spill] sm:$0xff] }
  0xd7   : > { %v500_v43 = vmul.f32 %v2662_v15, %v2601_v17  ;;  %v541_v7 = vmul.f32 %v2663_v14, %v2603_v9  ;;  %v2664_v29 = vld [vmem:[#allocation36_spill] sm:$0xff]  ;;  %v546_v41 = vmul.f32 %v2665_v1, %v2606_v3  ;;  %v2666_v49 = vld [vmem:[#allocation42_spill] sm:$0xff]  ;;  %v2667_v45 = vld [vmem:[#allocation47_spill] sm:$0xff]  ;;  %v886_v12 = vadd.f32 %v882_v61, %v877_v48 }
  0xd8   : > { %v486_v52 = vadd.f32 %v482_v55, %v477_v16  ;;  %v509_v24 = vmul.f32 %v2664_v29, %v2054_v2  ;;  %v555_v37 = vmul.f32 %v2667_v45, %v2666_v49  ;;  %v428_v34 = vadd.f32 %v424_v59, %v419_v11  ;;  %v2668_v6 = vld [vmem:[#allocation37_spill] sm:$0xff]  ;;  %v536_v62 = vld [vmem:[#allocation2 + $0x92] sm:$0xf]  ;;  %v2671_v61 = vld [vmem:[#allocation55_spill] sm:$0xff] }
  0xd9   : > { %v518_v17 = vmul.f32 %v2668_v6, %v463_v38  ;;  %v2669_v39 = vld [vmem:[#allocation44_spill] sm:$0xff]  ;;  %v550_v47 = vadd.f32 %v546_v41, %v541_v7  ;;  %v2670_v55 = vld [vmem:[#allocation45_spill] sm:$0xff]  ;;  %v614_v3 = vmul.f32 %v2613_v18, %v2543_v25  ;;  %v890_v4 = vadd.f32 %v886_v12, %v817_v28  ;;  %v2677_v7 = vld [vmem:[#allocation71_spill] sm:$0xff] }
  0xda   : > { %v564_v27 = vmul.f32 %v2669_v39, %v2610_v57  ;;  %v495_v9 = vadd.f32 %v491_v50, %v486_v52  ;;  %v573_v2 = vmul.f32 %v2670_v55, %v1972_v22  ;;  %v437_v33 = vadd.f32 %v433_v35, %v428_v34  ;;  %v2672_v57 = vld [vmem:[#allocation48_spill] sm:$0xff]  ;;  %v2673_v42 = vld [vmem:[#allocation49_spill] sm:$0xff]  ;;  %v2676_v35 = vld [vmem:[#allocation58_spill] sm:$0xff] }
  0xdb   : > { %v619_v59 = vmul.f32 %v2671_v61, %v2545_v44  ;;  %v559_v16 = vadd.f32 %v555_v37, %v550_v47  ;;  %v582_v26 = vmul.f32 %v2672_v57, %v2076_v20  ;;  %v591_v50 = vmul.f32 %v2673_v42, %v536_v62  ;;  %894 = vst [vmem:[%s1463_s18 + $0x8] sm:$0xf] %v890_v4  ;;  %v2674_v48 = vld [vmem:[#allocation65_spill] sm:$0xff]  ;;  %v609_v14 = vld [vmem:[#allocation2 + $0x93] sm:$0xf]  ;;  %v2680_v12 = vld [vmem:[#allocation79_spill] sm:$0xff] }
  0xdc   : > { %v504_v38 = vadd.f32 %v500_v43, %v495_v9  ;;  %v446_v22 = vadd.f32 %v442_v58, %v437_v33  ;;  %v2675_v25 = vld [vmem:[#allocation57_spill] sm:$0xff]  ;;  %v646_v28 = vmul.f32 %v2676_v35, %v1975_v54  ;;  %v692_v20 = vmul.f32 %v2621_v0, %v2558_v51  ;;  %v2686_v47 = vld [vmem:[#allocation78_spill] sm:$0xff]  ;;  %v2687_v55 = vld [vmem:[#allocation91_spill] sm:$0xff] }
  0xdd   : > { %v623_v15 = vadd.f32 %v619_v59, %v614_v3  ;;  %v637_v18 = vmul.f32 %v2675_v25, %v2674_v48  ;;  %v568_v11 = vadd.f32 %v564_v27, %v559_v16  ;;  %v655_v58 = vmul.f32 %v2622_v8, %v2086_v36  ;;  %v2678_v30 = vld [vmem:[#allocation61_spill] sm:$0xff]  ;;  %v2684_v27 = vld [vmem:[#allocation98_spill] sm:$0xff]  ;;  %v2690_v33 = vld [vmem:[#allocation104_spill] sm:$0xff] }
  0xde   : > { %v513_v44 = vadd.f32 %v509_v24, %v504_v38  ;;  %v453_v5 = vadd.f32 %v1839_v13, %v446_v22  ;;  %v701_v52 = vmul.f32 %v2677_v7, %v1816_v21  ;;  %v682_v24 = vld [vmem:[#allocation2 + $0x94] sm:$0xf]  ;;  %v696_v1 = vadd.f32 %v692_v20, %v687_v32  ;;  %v2679_v21 = vld [vmem:[#allocation87_spill] sm:$0xff]  ;;  %v2682_v6 = vld [vmem:[#allocation93_spill] sm:$0xff] }
  0xdf   : > { %v632_v43 = vadd.f32 %v628_v46, %v623_v15  ;;  %v577_v54 = vadd.f32 %v573_v2, %v568_v11  ;;  %v710_v41 = vmul.f32 %v2624_v60, %v1854_v23  ;;  %v664_v49 = vmul.f32 %v2678_v30, %v609_v14  ;;  %v2681_v23 = vld [vmem:[#allocation89_spill] sm:$0xff]  ;;  %v2689_v3 = vld [vmem:[#allocation94_spill] sm:$0xff]  ;;  %v2692_v16 = vld [vmem:[#allocation107_spill] sm:$0xff] }
  0xe0   : > { %v522_v29 = vadd.f32 %v518_v17, %v513_v44  ;;  %v719_v13 = vmul.f32 %v2566_v53, %v1993_v63  ;;  %v760_v51 = vmul.f32 %v1819_v31, %v1857_v19  ;;  %v705_v8 = vadd.f32 %v701_v52, %v696_v1  ;;  %v2683_v17 = vld [vmem:[#allocation88_spill] sm:$0xff]  ;;  %v2685_v31 = vld [vmem:[#allocation90_spill] sm:$0xff]  ;;  %v2693_v57 = vld [vmem:[#allocation97_spill] sm:$0xff] }
  0xe1   : > { %v641_v40 = vadd.f32 %v637_v18, %v632_v43  ;;  %v586_v0 = vadd.f32 %v582_v26, %v577_v54  ;;  %v765_v45 = vmul.f32 %v2679_v21, %v1864_v56  ;;  %v728_v34 = vmul.f32 %v2680_v12, %v2108_v10  ;;  %v2688_v56 = vld [vmem:[#allocation101_spill] sm:$0xff]  ;;  %v2691_v10 = vld [vmem:[#allocation95_spill] sm:$0xff]  ;;  %v2697_v44 = vld [vmem:[#allocation92_spill] sm:$0xff] }
  0xe2   : > { %v526_v36 = vadd.f32 %v522_v29, %v453_v5  ;;  %v737_v60 = vmul.f32 %v2681_v23, %v682_v24  ;;  %v774_v62 = vmul.f32 %v2683_v17, %v2682_v6  ;;  %v714_v63 = vadd.f32 %v710_v41, %v705_v8  ;;  %v2694_v15 = vld [vmem:[#allocation105_spill] sm:$0xff]  ;;  %v2695_v48 = vld [vmem:[#allocation99_spill] sm:$0xff]  ;;  %v2699_v5 = vld [vmem:[#allocation100_spill] sm:$0xff] }
  0xe3   : > { %v650_v37 = vadd.f32 %v646_v28, %v641_v40  ;;  %v595_v39 = vadd.f32 %v591_v50, %v586_v0  ;;  %v769_v53 = vadd.f32 %v765_v45, %v760_v51  ;;  %v783_v19 = vmul.f32 %v2685_v31, %v2684_v27  ;;  %v755_v50 = vld [vmem:[#allocation2 + $0x95] sm:$0xf]  ;;  %v2696_v28 = vld [vmem:[#allocation66_spill] sm:$0xff]  ;;  %v2698_v20 = vld [vmem:[#allocation51_spill] sm:$0xff] }
  0xe4   : > { %v792_v2 = vmul.f32 %v2687_v55, %v2686_v47  ;;  %v833_v4 = vmul.f32 %v2689_v3, %v2688_v56  ;;  %v838_v61 = vmul.f32 %v2691_v10, %v2690_v33  ;;  %v723_v46 = vadd.f32 %v719_v13, %v714_v63  ;;  %v2700_v52 = vld [vmem:[#allocation96_spill] sm:$0xff]  ;;  %v2701_v1 = vld [vmem:[#allocation59_spill] sm:$0xff]  ;;  %v2702_v41 = vld [vmem:[#allocation106_spill] sm:$0xff] }
  0xe5   : > { %v659_v9 = vadd.f32 %v655_v58, %v650_v37  ;;  %v599_v59 = vadd.f32 %v595_v39, %v526_v36  ;;  %v778_v38 = vadd.f32 %v774_v62, %v769_v53  ;;  %v847_v26 = vmul.f32 %v2693_v57, %v2692_v16  ;;  %v828_v54 = vld [vmem:[#allocation2 + $0x96] sm:$0xf]  ;;  %v2703_v51 = vld [vmem:[#allocation102_spill] sm:$0xff] }
  0xe6   : > { %v842_v22 = vadd.f32 %v838_v61, %v833_v4  ;;  %v856_v25 = vmul.f32 %v2695_v48, %v2694_v15  ;;  %v732_v18 = vadd.f32 %v728_v34, %v723_v46  ;;  %v801_v11 = vmul.f32 %v2697_v44, %v2696_v28 }
  0xe7   : > { %v668_v42 = vadd.f32 %v664_v49, %v659_v9  ;;  %v787_v35 = vadd.f32 %v783_v19, %v778_v38  ;;  %v865_v43 = vmul.f32 %v2699_v5, %v2698_v20  ;;  %v810_v29 = vmul.f32 %v2700_v52, %v755_v50 }
  0xe8   : > { %v851_v32 = vadd.f32 %v847_v26, %v842_v22  ;;  %v741_v58 = vadd.f32 %v737_v60, %v732_v18  ;;  %v874_v40 = vmul.f32 %v2702_v41, %v2701_v1  ;;  %v883_v36 = vmul.f32 %v2703_v51, %v828_v54 }
  0xe9   : > { %v672_v14 = vadd.f32 %v668_v42, %v599_v59  ;;  %v796_v7 = vadd.f32 %v792_v2, %v787_v35 }
  0xea   : > { %v860_v24 = vadd.f32 %v856_v25, %v851_v32 }
  0xeb   : > { %v745_v30 = vadd.f32 %v741_v58, %v672_v14  ;;  %v805_v49 = vadd.f32 %v801_v11, %v796_v7 }
  0xec   : > { %v869_v13 = vadd.f32 %v865_v43, %v860_v24 }
  0xed   : > { %v814_v0 = vadd.f32 %v810_v29, %v805_v49 }
  0xee   : > { %v878_v8 = vadd.f32 %v874_v40, %v869_v13 }
  0xef   : > { %v818_v21 = vadd.f32 %v814_v0, %v745_v30 }
  0xf0   : > { %v887_v45 = vadd.f32 %v883_v36, %v878_v8 }
  0xf2   : > { %v891_v37 = vadd.f32 %v887_v45, %v818_v21 }
  0xf4   : > { %895 = vst [vmem:[%s1463_s18 + $0xc] sm:$0xf] %v891_v37 }
  0xf5   : > { %1301 = shalt.err (!%p1298_p13)
}
  0xf6   : > { %1149 = dma.vmem_to_hbm [thread:$0]  (%p1428_p4), %s913_s27, 256, %s915_s28, %s897_s29, %s1364_s9, %s1364_s9, %s1366_s11  }
  0xf7 PF: > { %p1161_p0 = scmp.ge.s32.totalorder %s1358_s17, 2  ;;  %s929_s6 = sand.u32 1, %s1338_s12  }
  0xf8   : > { %s930_s18 = scalar_lea.sflag [#allocation6], %s929_s6 }
  0xf9   : > { %p1156_p1 = pnand %p1161_p0, %p1435_p8 }
  0xfb   : > { %p1157_p2 = pneg %p1156_p1 }
  0xfd   : > { %1333 = dma.done.wait (%p1157_p2), %s930_s18, 256  }
  0xfe   : > { %1335 = vsyncadd (%p1157_p2), %s930_s18, 4294967040  ;;  %s17_s17 = sadd.s32 1, %s1358_s17   ;;  %s2704_s12 = smov %s1342_s13 }
  0xff   : > { %p14_p3 = scmp.ge.s32.totalorder %s17_s17, 4   ;;  %s2705_s13 = smov %s1346_s14 }
 0x100   : > { %s2706_s14 = smov %s1441_s25  ;;  %s2707_s15 = smov %s1354_s16 }
 0x101   : > { %s2708_s16 = smov %s2710_s20  ;;  %16 = sbr.rel (!%p14_p3) target bundleno = 5 (0x5), region = 129 }
 0x106   :  { %936 = vsyncpa [#allocation5], 1 }
 0x107   :  { %938 = vsyncpa [#allocation5 + $0x1], 1 }
 0x108   :  { %939 = vsyncpa [#allocation6], 1 }
 0x109   :  { %941 = vsyncpa [#allocation6 + $0x1], 1 }
 0x10a   :  { %942 = vsyncmov [#allocation3] }
 0x10d   :  { %s943_s22 = vpop.sfrf %942 }
 0x10e   :  { %p1138_p4 = scmp.ne.s32.totalorder %s943_s22, 0 }
 0x110   :  { %947 = shalt.err (%p1138_p4)  }
 0x111   :  { %949 = vsyncmov [#allocation3 + $0x1] }
 0x114   :  { %s950_s24 = vpop.sfrf %949 }
 0x115   :  { %p1139_p8 = scmp.ne.s32.totalorder %s950_s24, 0 }
 0x117   :  { %954 = shalt.err (%p1139_p8)  }
 0x118   :  { %956 = vsyncmov [#allocation3 + $0x2] }
 0x11b   :  { %s957_s25 = vpop.sfrf %956 }
 0x11c   :  { %p1140_p5 = scmp.ne.s32.totalorder %s957_s25, 0 }
 0x11e   :  { %961 = shalt.err (%p1140_p5)  }
 0x11f   :  { %963 = vsyncmov [#allocation3 + $0x3] }
 0x122   :  { %s964_s20 = vpop.sfrf %963 }
 0x123   :  { %p1141_p6 = scmp.ne.s32.totalorder %s964_s20, 0 }
 0x125   :  { %968 = shalt.err (%p1141_p6)  }
 0x126   :  { %970 = vsyncmov [#allocation3 + $0x4] }
 0x129   :  { %s971_s0 = vpop.sfrf %970 }
 0x12a   :  { %p1142_p7 = scmp.ne.s32.totalorder %s971_s0, 0 }
 0x12c   :  { %975 = shalt.err (%p1142_p7)  }
 0x12d   :  { %977 = vsyncmov [#allocation3 + $0x5] }
 0x130   :  { %s978_s1 = vpop.sfrf %977 }
 0x131   :  { %p1143_p9 = scmp.ne.s32.totalorder %s978_s1, 0 }
 0x133   :  { %982 = shalt.err (%p1143_p9)  }

</bundles_post_ra>
